<compile_context>
chip_gen: v7x
topology: tpu7x:2x2x1
jax: 0.10.0
libtpu: 0.0.40
codegen_flags: <defaults>
</compile_context>

<pallas_src>
import functools

import jax
import jax.numpy as jnp
from jax.experimental import pallas as pl
from jax.experimental.pallas import tpu as pltpu


# ----------------------------------------------------------------------------
# Single fused kernel: AGC (+sigmoid) -> 4 LSTMs -> splicing -> dense+sigmoid
# ----------------------------------------------------------------------------
def fused_kernel(B, T, N, H, BNP,
                 x_ref, a_ref, wgc_ref, bgc_ref,
                 wih_ref, whh_ref, bpk_ref, wout_ref, bout_ref,
                 o_ref, spl_ref):
    LH = 4 * H                 # 4 LSTMs x H  = 128 lanes (h/c width, gate block width)

    # ---- Adaptive graph conv: rows of a_ref are already permuted+padded into
    #      time-major LSTM order, so one matmul yields the LSTM input layout.
    xw = jnp.dot(x_ref[...], wgc_ref[...],
                 preferred_element_type=jnp.float32)                  # (B*T*N, H)
    gcn = jnp.dot(a_ref[...], xw,
                  preferred_element_type=jnp.float32) + bgc_ref[...]  # (T*BNP, H)
    lstm_in = jax.nn.sigmoid(gcn)                                     # == F.sigmoid(GCNoutput)

    # ---- Hoisted input projection for all 4 LSTMs / all 4 gates (+ biases).
    proj = jnp.dot(lstm_in, wih_ref[...],
                   preferred_element_type=jnp.float32) + bpk_ref[...]  # (T*BNP, 4*LH)

    # ---- Recurrence: 4 LSTMs fused via block-diagonal W_hh, gate-major packing.
    whh = whh_ref[...]                                   # (LH, 4*LH)
    h = jnp.zeros((BNP, LH), jnp.float32)                # concat of 4 hidden states
    c = jnp.zeros((BNP, LH), jnp.float32)
    for t in range(T):                                   # static unroll (T small)
        gates = proj[t * BNP:(t + 1) * BNP, :] + jnp.dot(
            h, whh, preferred_element_type=jnp.float32)  # (BNP, 4*LH)
        i_g = jax.nn.sigmoid(gates[:, 0 * LH:1 * LH])    # 128-lane aligned slices
        f_g = jax.nn.sigmoid(gates[:, 1 * LH:2 * LH])
        g_g = jnp.tanh(gates[:, 2 * LH:3 * LH])
        o_g = jax.nn.sigmoid(gates[:, 3 * LH:4 * LH])
        c = f_g * c + i_g * g_g
        h = o_g * jnp.tanh(c)

    # ---- splicing: rows (b*N+n) of h -> (B, N*4H), 128-lane aligned copies.
    for b in range(B):
        for n in range(N):
            spl_ref[b:b + 1, n * LH:(n + 1) * LH] = h[b * N + n:b * N + n + 1, :]

    # ---- output layer + sigmoid (epilogue of the same kernel).
    out = jnp.dot(spl_ref[...], wout_ref[...],
                  preferred_element_type=jnp.float32) + bout_ref[...]
    o_ref[...] = jax.nn.sigmoid(out).astype(o_ref.dtype)


# ----------------------------------------------------------------------------
# Wrapper
# ----------------------------------------------------------------------------
@jax.jit
def my_model_forward(x, params):
    B, T, N, F = x.shape
    H = params["w_gc"].shape[1]
    BNP = params["a_pp"].shape[0] // T
    x2d = x.reshape(B * T * N, F)                 # contiguous, free under jit

    kernel = functools.partial(fused_kernel, B, T, N, H, BNP)
    return pl.pallas_call(
        kernel,
        out_shape=jax.ShapeDtypeStruct((B, 3), jnp.float32),
        scratch_shapes=[pltpu.VMEM((B, N * 4 * H), jnp.float32)],
    )(x2d, params["a_pp"], params["w_gc"], params["b_gc"],
      params["w_ih_pack"], params["w_hh_blk"], params["b_pack"],
      params["w_out"], params["b_out"])


# ----------------------------------------------------------------------------
# Deterministic parameters + kernel-side packing
# ----------------------------------------------------------------------------
def init_params(key, *, batch_size, time_steps, hidden_size, feature, num_car):
    B, T, H, F, N = batch_size, time_steps, hidden_size, feature, num_car
    L, G = 4, 4                              # 4 LSTMs, 4 gates (i, f, g, o)
    BN = B * N
    BNP = ((BN + 7) // 8) * 8                # pad LSTM batch rows to sublane multiple
    ks = jax.random.split(key, 10)

    # Adaptive graph conv (assumed form, see TODO at top of file).
    e1 = jax.random.normal(ks[0], (N, 8), jnp.float32) * 0.5
    e2 = jax.random.normal(ks[1], (N, 8), jnp.float32) * 0.5
    a_norm = jax.nn.softmax(jax.nn.relu(e1 @ e2.T), axis=-1)          # (N, N)
    w_gc = jax.random.normal(ks[2], (F, H), jnp.float32) * 0.2
    b_gc = jax.random.normal(ks[3], (H,), jnp.float32) * 0.05

    # 4 LSTMs, PyTorch gate order (i, f, g, o); weights stored pre-transposed.
    w_ih = jax.random.normal(ks[4], (L, H, G * H), jnp.float32) * 0.1
    w_hh = jax.random.normal(ks[5], (L, H, G * H), jnp.float32) * 0.1
    b_ih = jax.random.normal(ks[6], (L, G * H), jnp.float32) * 0.05
    b_hh = jax.random.normal(ks[7], (L, G * H), jnp.float32) * 0.05
    b_sum = b_ih + b_hh

    # Output layer.
    w_out = jax.random.normal(ks[8], (H * L * N, 3), jnp.float32) * 0.05
    b_out = jax.random.normal(ks[9], (3,), jnp.float32) * 0.05

    # ---------------- packed parameters for the fused kernel ----------------
    # (1) Permuted + padded block-diagonal adjacency.  The model's raw reshape
    #     maps gcn flat row q = (b*T+t)*N+n to LSTM row i, time j with
    #     q = i*T + j.  Row (t*BNP + i) of a_pp therefore holds row (i*T + t)
    #     of kron(I_{B*T}, A); rows i >= B*N are zero padding.
    a_big = jnp.kron(jnp.eye(B * T, dtype=jnp.float32), a_norm)       # (B*T*N, B*T*N)
    blocks = []
    for t in range(T):
        q = jnp.arange(BN) * T + t
        blk = a_big[q]                                                # (BN, B*T*N)
        blk = jnp.concatenate(
            [blk, jnp.zeros((BNP - BN, B * T * N), jnp.float32)], axis=0)
        blocks.append(blk)
    a_pp = jnp.concatenate(blocks, axis=0)                            # (T*BNP, B*T*N)

    # (2) Gate-major packing: column index = gate*(L*H) + lstm*H + k, so each
    #     gate occupies a 128-lane aligned block and h/c concat the 4 LSTMs.
    w_ih_pack = (w_ih.reshape(L, H, G, H)
                 .transpose(1, 2, 0, 3).reshape(H, G * L * H))        # (H, 512)
    w_hh_blk = jnp.einsum(
        'lkgo,lm->lkgmo', w_hh.reshape(L, H, G, H),
        jnp.eye(L, dtype=jnp.float32)).reshape(L * H, G * L * H)      # (128, 512)
    b_pack = b_sum.reshape(L, G, H).transpose(1, 0, 2).reshape(1, G * L * H)

    return dict(
        # raw params (used by the pure-JAX reference)
        a_norm=a_norm, w_gc=w_gc, b_gc=b_gc.reshape(1, H),
        w_ih=w_ih, w_hh=w_hh, b_sum=b_sum,
        w_out=w_out, b_out=b_out.reshape(1, 3),
        # packed params consumed by the fused kernel
        a_pp=a_pp, w_ih_pack=w_ih_pack, w_hh_blk=w_hh_blk, b_pack=b_pack,
    )


# ----------------------------------------------------------------------------
# Pure-JAX reference (mirrors the PyTorch forward, incl. the raw reshape)
# ----------------------------------------------------------------------------
def reference_forward(x, params):
    B, T, N, F = x.shape
    H = params["w_gc"].shape[1]
    hi = jax.lax.Precision.HIGHEST
    xw = jnp.einsum('btnf,fh->btnh', x, params["w_gc"], precision=hi)
    gcn = jnp.einsum('nm,btmh->btnh', params["a_norm"], xw,
                     precision=hi) + params["b_gc"]
    lstm_in = jax.nn.sigmoid(gcn.reshape(B * N, T, H))
    hs = []
    for l in range(4):
        h = jnp.zeros((B * N, H), jnp.float32)
        c = jnp.zeros((B * N, H), jnp.float32)
        for t in range(T):
            g = (jnp.dot(lstm_in[:, t, :], params["w_ih"][l], precision=hi)
                 + jnp.dot(h, params["w_hh"][l], precision=hi)
                 + params["b_sum"][l])
            i_g = jax.nn.sigmoid(g[:, 0 * H:1 * H])
            f_g = jax.nn.sigmoid(g[:, 1 * H:2 * H])
            g_g = jnp.tanh(g[:, 2 * H:3 * H])
            o_g = jax.nn.sigmoid(g[:, 3 * H:4 * H])
            c = f_g * c + i_g * g_g
            h = o_g * jnp.tanh(c)
        hs.append(h)
    spl = jnp.concatenate(hs, axis=-1).reshape(B, -1)
    return jax.nn.sigmoid(jnp.dot(spl, params["w_out"], precision=hi)
                          + params["b_out"])


if __name__ == "__main__":
    # Small shapes consistent with the module:
    # batch=2, time_steps=8, num_car=7, feature=4, hidden_size=32
    B, T, N, F, H = 2, 8, 7, 4, 32

    key = jax.random.PRNGKey(0)
    k_x, k_p = jax.random.split(key)
    x = jax.random.normal(k_x, (B, T, N, F), jnp.float32)
    params = init_params(k_p, batch_size=B, time_steps=T,
                         hidden_size=H, feature=F, num_car=N)

    out = jax.block_until_ready(my_model_forward(x, params))
    assert out.shape == (B, 3), out.shape

    ref = jax.block_until_ready(reference_forward(x, params))
    assert bool(jnp.allclose(out, ref, atol=5e-3, rtol=5e-3)), (
        "max abs diff vs reference: %s" % jnp.max(jnp.abs(out - ref)))

    print("KERNEL_OK")
</pallas_src>

<mosaic_0001>
module attributes {stable_mosaic.version = 11 : i64} {
  func.func @fused_kernel(%arg0: memref<112x4xf32, #tpu.memory_space<vmem>>, %arg1: memref<128x112xf32, #tpu.memory_space<vmem>>, %arg2: memref<4x32xf32, #tpu.memory_space<vmem>>, %arg3: memref<1x32xf32, #tpu.memory_space<vmem>>, %arg4: memref<32x512xf32, #tpu.memory_space<vmem>>, %arg5: memref<128x512xf32, #tpu.memory_space<vmem>>, %arg6: memref<1x512xf32, #tpu.memory_space<vmem>>, %arg7: memref<896x3xf32, #tpu.memory_space<vmem>>, %arg8: memref<1x3xf32, #tpu.memory_space<vmem>>, %arg9: memref<2x3xf32, #tpu.memory_space<vmem>>, %arg10: memref<2x896xf32, #tpu.memory_space<vmem>>) attributes {dimension_semantics = [], scalar_prefetch = 0 : i64, scratch_operands = 1 : i64, tpu.core_type = #tpu.core_type<tc>} {
    %c0 = arith.constant 0 : index
    %c0_0 = arith.constant 0 : index
    %0 = vector.load %arg0[%c0, %c0_0] : memref<112x4xf32, #tpu.memory_space<vmem>>, vector<112x4xf32>
    %c0_1 = arith.constant 0 : index
    %c0_2 = arith.constant 0 : index
    %1 = vector.load %arg2[%c0_1, %c0_2] : memref<4x32xf32, #tpu.memory_space<vmem>>, vector<4x32xf32>
    %cst = arith.constant dense<0.000000e+00> : vector<112x32xf32>
    %2 = tpu.matmul %0, %1, %cst {dimension_numbers = #tpu.dot_dimension_numbers<[1], [0], [0], [1], [0, 0, 1, 1], [], []>} : vector<112x4xf32>, vector<4x32xf32>, vector<112x32xf32> -> vector<112x32xf32>
    %c0_3 = arith.constant 0 : index
    %c0_4 = arith.constant 0 : index
    %3 = vector.load %arg1[%c0_3, %c0_4] : memref<128x112xf32, #tpu.memory_space<vmem>>, vector<128x112xf32>
    %cst_5 = arith.constant dense<0.000000e+00> : vector<128x32xf32>
    %4 = tpu.matmul %3, %2, %cst_5 {dimension_numbers = #tpu.dot_dimension_numbers<[1], [0], [0], [1], [0, 0, 1, 1], [], []>} : vector<128x112xf32>, vector<112x32xf32>, vector<128x32xf32> -> vector<128x32xf32>
    %c0_6 = arith.constant 0 : index
    %c0_7 = arith.constant 0 : index
    %5 = vector.load %arg3[%c0_6, %c0_7] : memref<1x32xf32, #tpu.memory_space<vmem>>, vector<1x32xf32>
    %6 = vector.broadcast %5 : vector<1x32xf32> to vector<128x32xf32>
    %7 = arith.addf %4, %6 : vector<128x32xf32>
    %8 = arith.negf %7 : vector<128x32xf32>
    %9 = math.exp %8 : vector<128x32xf32>
    %cst_8 = arith.constant 1.000000e+00 : f32
    %10 = vector.broadcast %cst_8 : f32 to vector<128x32xf32>
    %11 = arith.addf %10, %9 : vector<128x32xf32>
    %12 = arith.divf %10, %11 : vector<128x32xf32>
    %c0_9 = arith.constant 0 : index
    %c0_10 = arith.constant 0 : index
    %13 = vector.load %arg4[%c0_9, %c0_10] : memref<32x512xf32, #tpu.memory_space<vmem>>, vector<32x512xf32>
    %cst_11 = arith.constant dense<0.000000e+00> : vector<128x512xf32>
    %14 = tpu.matmul %12, %13, %cst_11 {dimension_numbers = #tpu.dot_dimension_numbers<[1], [0], [0], [1], [0, 0, 1, 1], [], []>} : vector<128x32xf32>, vector<32x512xf32>, vector<128x512xf32> -> vector<128x512xf32>
    %c0_12 = arith.constant 0 : index
    %c0_13 = arith.constant 0 : index
    %15 = vector.load %arg6[%c0_12, %c0_13] : memref<1x512xf32, #tpu.memory_space<vmem>>, vector<1x512xf32>
    %16 = vector.broadcast %15 : vector<1x512xf32> to vector<128x512xf32>
    %17 = arith.addf %14, %16 : vector<128x512xf32>
    %c0_14 = arith.constant 0 : index
    %c0_15 = arith.constant 0 : index
    %18 = vector.load %arg5[%c0_14, %c0_15] : memref<128x512xf32, #tpu.memory_space<vmem>>, vector<128x512xf32>
    %cst_16 = arith.constant 0.000000e+00 : f32
    %19 = vector.broadcast %cst_16 : f32 to vector<16x128xf32>
    %cst_17 = arith.constant 0.000000e+00 : f32
    %20 = vector.broadcast %cst_17 : f32 to vector<16x128xf32>
    %21 = vector.extract_strided_slice %17 {offsets = [0, 0], sizes = [16, 512], strides = [1, 1]} : vector<128x512xf32> to vector<16x512xf32>
    %cst_18 = arith.constant dense<0.000000e+00> : vector<16x512xf32>
    %22 = tpu.matmul %19, %18, %cst_18 {dimension_numbers = #tpu.dot_dimension_numbers<[1], [0], [0], [1], [0, 0, 1, 1], [], []>} : vector<16x128xf32>, vector<128x512xf32>, vector<16x512xf32> -> vector<16x512xf32>
    %23 = arith.addf %21, %22 : vector<16x512xf32>
    %24 = vector.extract_strided_slice %23 {offsets = [0, 0], sizes = [16, 128], strides = [1, 1]} : vector<16x512xf32> to vector<16x128xf32>
    %25 = arith.negf %24 : vector<16x128xf32>
    %26 = math.exp %25 : vector<16x128xf32>
    %cst_19 = arith.constant 1.000000e+00 : f32
    %27 = vector.broadcast %cst_19 : f32 to vector<16x128xf32>
    %28 = arith.addf %27, %26 : vector<16x128xf32>
    %29 = arith.divf %27, %28 : vector<16x128xf32>
    %30 = vector.extract_strided_slice %23 {offsets = [0, 128], sizes = [16, 128], strides = [1, 1]} : vector<16x512xf32> to vector<16x128xf32>
    %31 = arith.negf %30 : vector<16x128xf32>
    %32 = math.exp %31 : vector<16x128xf32>
    %cst_20 = arith.constant 1.000000e+00 : f32
    %33 = vector.broadcast %cst_20 : f32 to vector<16x128xf32>
    %34 = arith.addf %33, %32 : vector<16x128xf32>
    %35 = arith.divf %33, %34 : vector<16x128xf32>
    %36 = vector.extract_strided_slice %23 {offsets = [0, 256], sizes = [16, 128], strides = [1, 1]} : vector<16x512xf32> to vector<16x128xf32>
    %37 = math.tanh %36 : vector<16x128xf32>
    %38 = vector.extract_strided_slice %23 {offsets = [0, 384], sizes = [16, 128], strides = [1, 1]} : vector<16x512xf32> to vector<16x128xf32>
    %39 = arith.negf %38 : vector<16x128xf32>
    %40 = math.exp %39 : vector<16x128xf32>
    %cst_21 = arith.constant 1.000000e+00 : f32
    %41 = vector.broadcast %cst_21 : f32 to vector<16x128xf32>
    %42 = arith.addf %41, %40 : vector<16x128xf32>
    %43 = arith.divf %41, %42 : vector<16x128xf32>
    %44 = arith.mulf %35, %20 : vector<16x128xf32>
    %45 = arith.mulf %29, %37 : vector<16x128xf32>
    %46 = arith.addf %44, %45 : vector<16x128xf32>
    %47 = math.tanh %46 : vector<16x128xf32>
    %48 = arith.mulf %43, %47 : vector<16x128xf32>
    %49 = vector.extract_strided_slice %17 {offsets = [16, 0], sizes = [16, 512], strides = [1, 1]} : vector<128x512xf32> to vector<16x512xf32>
    %cst_22 = arith.constant dense<0.000000e+00> : vector<16x512xf32>
    %50 = tpu.matmul %48, %18, %cst_22 {dimension_numbers = #tpu.dot_dimension_numbers<[1], [0], [0], [1], [0, 0, 1, 1], [], []>} : vector<16x128xf32>, vector<128x512xf32>, vector<16x512xf32> -> vector<16x512xf32>
    %51 = arith.addf %49, %50 : vector<16x512xf32>
    %52 = vector.extract_strided_slice %51 {offsets = [0, 0], sizes = [16, 128], strides = [1, 1]} : vector<16x512xf32> to vector<16x128xf32>
    %53 = arith.negf %52 : vector<16x128xf32>
    %54 = math.exp %53 : vector<16x128xf32>
    %cst_23 = arith.constant 1.000000e+00 : f32
    %55 = vector.broadcast %cst_23 : f32 to vector<16x128xf32>
    %56 = arith.addf %55, %54 : vector<16x128xf32>
    %57 = arith.divf %55, %56 : vector<16x128xf32>
    %58 = vector.extract_strided_slice %51 {offsets = [0, 128], sizes = [16, 128], strides = [1, 1]} : vector<16x512xf32> to vector<16x128xf32>
    %59 = arith.negf %58 : vector<16x128xf32>
    %60 = math.exp %59 : vector<16x128xf32>
    %cst_24 = arith.constant 1.000000e+00 : f32
    %61 = vector.broadcast %cst_24 : f32 to vector<16x128xf32>
    %62 = arith.addf %61, %60 : vector<16x128xf32>
    %63 = arith.divf %61, %62 : vector<16x128xf32>
    %64 = vector.extract_strided_slice %51 {offsets = [0, 256], sizes = [16, 128], strides = [1, 1]} : vector<16x512xf32> to vector<16x128xf32>
    %65 = math.tanh %64 : vector<16x128xf32>
    %66 = vector.extract_strided_slice %51 {offsets = [0, 384], sizes = [16, 128], strides = [1, 1]} : vector<16x512xf32> to vector<16x128xf32>
    %67 = arith.negf %66 : vector<16x128xf32>
    %68 = math.exp %67 : vector<16x128xf32>
    %cst_25 = arith.constant 1.000000e+00 : f32
    %69 = vector.broadcast %cst_25 : f32 to vector<16x128xf32>
    %70 = arith.addf %69, %68 : vector<16x128xf32>
    %71 = arith.divf %69, %70 : vector<16x128xf32>
    %72 = arith.mulf %63, %46 : vector<16x128xf32>
    %73 = arith.mulf %57, %65 : vector<16x128xf32>
    %74 = arith.addf %72, %73 : vector<16x128xf32>
    %75 = math.tanh %74 : vector<16x128xf32>
    %76 = arith.mulf %71, %75 : vector<16x128xf32>
    %77 = vector.extract_strided_slice %17 {offsets = [32, 0], sizes = [16, 512], strides = [1, 1]} : vector<128x512xf32> to vector<16x512xf32>
    %cst_26 = arith.constant dense<0.000000e+00> : vector<16x512xf32>
    %78 = tpu.matmul %76, %18, %cst_26 {dimension_numbers = #tpu.dot_dimension_numbers<[1], [0], [0], [1], [0, 0, 1, 1], [], []>} : vector<16x128xf32>, vector<128x512xf32>, vector<16x512xf32> -> vector<16x512xf32>
    %79 = arith.addf %77, %78 : vector<16x512xf32>
    %80 = vector.extract_strided_slice %79 {offsets = [0, 0], sizes = [16, 128], strides = [1, 1]} : vector<16x512xf32> to vector<16x128xf32>
    %81 = arith.negf %80 : vector<16x128xf32>
    %82 = math.exp %81 : vector<16x128xf32>
    %cst_27 = arith.constant 1.000000e+00 : f32
    %83 = vector.broadcast %cst_27 : f32 to vector<16x128xf32>
    %84 = arith.addf %83, %82 : vector<16x128xf32>
    %85 = arith.divf %83, %84 : vector<16x128xf32>
    %86 = vector.extract_strided_slice %79 {offsets = [0, 128], sizes = [16, 128], strides = [1, 1]} : vector<16x512xf32> to vector<16x128xf32>
    %87 = arith.negf %86 : vector<16x128xf32>
    %88 = math.exp %87 : vector<16x128xf32>
    %cst_28 = arith.constant 1.000000e+00 : f32
    %89 = vector.broadcast %cst_28 : f32 to vector<16x128xf32>
    %90 = arith.addf %89, %88 : vector<16x128xf32>
    %91 = arith.divf %89, %90 : vector<16x128xf32>
    %92 = vector.extract_strided_slice %79 {offsets = [0, 256], sizes = [16, 128], strides = [1, 1]} : vector<16x512xf32> to vector<16x128xf32>
    %93 = math.tanh %92 : vector<16x128xf32>
    %94 = vector.extract_strided_slice %79 {offsets = [0, 384], sizes = [16, 128], strides = [1, 1]} : vector<16x512xf32> to vector<16x128xf32>
    %95 = arith.negf %94 : vector<16x128xf32>
    %96 = math.exp %95 : vector<16x128xf32>
    %cst_29 = arith.constant 1.000000e+00 : f32
    %97 = vector.broadcast %cst_29 : f32 to vector<16x128xf32>
    %98 = arith.addf %97, %96 : vector<16x128xf32>
    %99 = arith.divf %97, %98 : vector<16x128xf32>
    %100 = arith.mulf %91, %74 : vector<16x128xf32>
    %101 = arith.mulf %85, %93 : vector<16x128xf32>
    %102 = arith.addf %100, %101 : vector<16x128xf32>
    %103 = math.tanh %102 : vector<16x128xf32>
    %104 = arith.mulf %99, %103 : vector<16x128xf32>
    %105 = vector.extract_strided_slice %17 {offsets = [48, 0], sizes = [16, 512], strides = [1, 1]} : vector<128x512xf32> to vector<16x512xf32>
    %cst_30 = arith.constant dense<0.000000e+00> : vector<16x512xf32>
    %106 = tpu.matmul %104, %18, %cst_30 {dimension_numbers = #tpu.dot_dimension_numbers<[1], [0], [0], [1], [0, 0, 1, 1], [], []>} : vector<16x128xf32>, vector<128x512xf32>, vector<16x512xf32> -> vector<16x512xf32>
    %107 = arith.addf %105, %106 : vector<16x512xf32>
    %108 = vector.extract_strided_slice %107 {offsets = [0, 0], sizes = [16, 128], strides = [1, 1]} : vector<16x512xf32> to vector<16x128xf32>
    %109 = arith.negf %108 : vector<16x128xf32>
    %110 = math.exp %109 : vector<16x128xf32>
    %cst_31 = arith.constant 1.000000e+00 : f32
    %111 = vector.broadcast %cst_31 : f32 to vector<16x128xf32>
    %112 = arith.addf %111, %110 : vector<16x128xf32>
    %113 = arith.divf %111, %112 : vector<16x128xf32>
    %114 = vector.extract_strided_slice %107 {offsets = [0, 128], sizes = [16, 128], strides = [1, 1]} : vector<16x512xf32> to vector<16x128xf32>
    %115 = arith.negf %114 : vector<16x128xf32>
    %116 = math.exp %115 : vector<16x128xf32>
    %cst_32 = arith.constant 1.000000e+00 : f32
    %117 = vector.broadcast %cst_32 : f32 to vector<16x128xf32>
    %118 = arith.addf %117, %116 : vector<16x128xf32>
    %119 = arith.divf %117, %118 : vector<16x128xf32>
    %120 = vector.extract_strided_slice %107 {offsets = [0, 256], sizes = [16, 128], strides = [1, 1]} : vector<16x512xf32> to vector<16x128xf32>
    %121 = math.tanh %120 : vector<16x128xf32>
    %122 = vector.extract_strided_slice %107 {offsets = [0, 384], sizes = [16, 128], strides = [1, 1]} : vector<16x512xf32> to vector<16x128xf32>
    %123 = arith.negf %122 : vector<16x128xf32>
    %124 = math.exp %123 : vector<16x128xf32>
    %cst_33 = arith.constant 1.000000e+00 : f32
    %125 = vector.broadcast %cst_33 : f32 to vector<16x128xf32>
    %126 = arith.addf %125, %124 : vector<16x128xf32>
    %127 = arith.divf %125, %126 : vector<16x128xf32>
    %128 = arith.mulf %119, %102 : vector<16x128xf32>
    %129 = arith.mulf %113, %121 : vector<16x128xf32>
    %130 = arith.addf %128, %129 : vector<16x128xf32>
    %131 = math.tanh %130 : vector<16x128xf32>
    %132 = arith.mulf %127, %131 : vector<16x128xf32>
    %133 = vector.extract_strided_slice %17 {offsets = [64, 0], sizes = [16, 512], strides = [1, 1]} : vector<128x512xf32> to vector<16x512xf32>
    %cst_34 = arith.constant dense<0.000000e+00> : vector<16x512xf32>
    %134 = tpu.matmul %132, %18, %cst_34 {dimension_numbers = #tpu.dot_dimension_numbers<[1], [0], [0], [1], [0, 0, 1, 1], [], []>} : vector<16x128xf32>, vector<128x512xf32>, vector<16x512xf32> -> vector<16x512xf32>
    %135 = arith.addf %133, %134 : vector<16x512xf32>
    %136 = vector.extract_strided_slice %135 {offsets = [0, 0], sizes = [16, 128], strides = [1, 1]} : vector<16x512xf32> to vector<16x128xf32>
    %137 = arith.negf %136 : vector<16x128xf32>
    %138 = math.exp %137 : vector<16x128xf32>
    %cst_35 = arith.constant 1.000000e+00 : f32
    %139 = vector.broadcast %cst_35 : f32 to vector<16x128xf32>
    %140 = arith.addf %139, %138 : vector<16x128xf32>
    %141 = arith.divf %139, %140 : vector<16x128xf32>
    %142 = vector.extract_strided_slice %135 {offsets = [0, 128], sizes = [16, 128], strides = [1, 1]} : vector<16x512xf32> to vector<16x128xf32>
    %143 = arith.negf %142 : vector<16x128xf32>
    %144 = math.exp %143 : vector<16x128xf32>
    %cst_36 = arith.constant 1.000000e+00 : f32
    %145 = vector.broadcast %cst_36 : f32 to vector<16x128xf32>
    %146 = arith.addf %145, %144 : vector<16x128xf32>
    %147 = arith.divf %145, %146 : vector<16x128xf32>
    %148 = vector.extract_strided_slice %135 {offsets = [0, 256], sizes = [16, 128], strides = [1, 1]} : vector<16x512xf32> to vector<16x128xf32>
    %149 = math.tanh %148 : vector<16x128xf32>
    %150 = vector.extract_strided_slice %135 {offsets = [0, 384], sizes = [16, 128], strides = [1, 1]} : vector<16x512xf32> to vector<16x128xf32>
    %151 = arith.negf %150 : vector<16x128xf32>
    %152 = math.exp %151 : vector<16x128xf32>
    %cst_37 = arith.constant 1.000000e+00 : f32
    %153 = vector.broadcast %cst_37 : f32 to vector<16x128xf32>
    %154 = arith.addf %153, %152 : vector<16x128xf32>
    %155 = arith.divf %153, %154 : vector<16x128xf32>
    %156 = arith.mulf %147, %130 : vector<16x128xf32>
    %157 = arith.mulf %141, %149 : vector<16x128xf32>
    %158 = arith.addf %156, %157 : vector<16x128xf32>
    %159 = math.tanh %158 : vector<16x128xf32>
    %160 = arith.mulf %155, %159 : vector<16x128xf32>
    %161 = vector.extract_strided_slice %17 {offsets = [80, 0], sizes = [16, 512], strides = [1, 1]} : vector<128x512xf32> to vector<16x512xf32>
    %cst_38 = arith.constant dense<0.000000e+00> : vector<16x512xf32>
    %162 = tpu.matmul %160, %18, %cst_38 {dimension_numbers = #tpu.dot_dimension_numbers<[1], [0], [0], [1], [0, 0, 1, 1], [], []>} : vector<16x128xf32>, vector<128x512xf32>, vector<16x512xf32> -> vector<16x512xf32>
    %163 = arith.addf %161, %162 : vector<16x512xf32>
    %164 = vector.extract_strided_slice %163 {offsets = [0, 0], sizes = [16, 128], strides = [1, 1]} : vector<16x512xf32> to vector<16x128xf32>
    %165 = arith.negf %164 : vector<16x128xf32>
    %166 = math.exp %165 : vector<16x128xf32>
    %cst_39 = arith.constant 1.000000e+00 : f32
    %167 = vector.broadcast %cst_39 : f32 to vector<16x128xf32>
    %168 = arith.addf %167, %166 : vector<16x128xf32>
    %169 = arith.divf %167, %168 : vector<16x128xf32>
    %170 = vector.extract_strided_slice %163 {offsets = [0, 128], sizes = [16, 128], strides = [1, 1]} : vector<16x512xf32> to vector<16x128xf32>
    %171 = arith.negf %170 : vector<16x128xf32>
    %172 = math.exp %171 : vector<16x128xf32>
    %cst_40 = arith.constant 1.000000e+00 : f32
    %173 = vector.broadcast %cst_40 : f32 to vector<16x128xf32>
    %174 = arith.addf %173, %172 : vector<16x128xf32>
    %175 = arith.divf %173, %174 : vector<16x128xf32>
    %176 = vector.extract_strided_slice %163 {offsets = [0, 256], sizes = [16, 128], strides = [1, 1]} : vector<16x512xf32> to vector<16x128xf32>
    %177 = math.tanh %176 : vector<16x128xf32>
    %178 = vector.extract_strided_slice %163 {offsets = [0, 384], sizes = [16, 128], strides = [1, 1]} : vector<16x512xf32> to vector<16x128xf32>
    %179 = arith.negf %178 : vector<16x128xf32>
    %180 = math.exp %179 : vector<16x128xf32>
    %cst_41 = arith.constant 1.000000e+00 : f32
    %181 = vector.broadcast %cst_41 : f32 to vector<16x128xf32>
    %182 = arith.addf %181, %180 : vector<16x128xf32>
    %183 = arith.divf %181, %182 : vector<16x128xf32>
    %184 = arith.mulf %175, %158 : vector<16x128xf32>
    %185 = arith.mulf %169, %177 : vector<16x128xf32>
    %186 = arith.addf %184, %185 : vector<16x128xf32>
    %187 = math.tanh %186 : vector<16x128xf32>
    %188 = arith.mulf %183, %187 : vector<16x128xf32>
    %189 = vector.extract_strided_slice %17 {offsets = [96, 0], sizes = [16, 512], strides = [1, 1]} : vector<128x512xf32> to vector<16x512xf32>
    %cst_42 = arith.constant dense<0.000000e+00> : vector<16x512xf32>
    %190 = tpu.matmul %188, %18, %cst_42 {dimension_numbers = #tpu.dot_dimension_numbers<[1], [0], [0], [1], [0, 0, 1, 1], [], []>} : vector<16x128xf32>, vector<128x512xf32>, vector<16x512xf32> -> vector<16x512xf32>
    %191 = arith.addf %189, %190 : vector<16x512xf32>
    %192 = vector.extract_strided_slice %191 {offsets = [0, 0], sizes = [16, 128], strides = [1, 1]} : vector<16x512xf32> to vector<16x128xf32>
    %193 = arith.negf %192 : vector<16x128xf32>
    %194 = math.exp %193 : vector<16x128xf32>
    %cst_43 = arith.constant 1.000000e+00 : f32
    %195 = vector.broadcast %cst_43 : f32 to vector<16x128xf32>
    %196 = arith.addf %195, %194 : vector<16x128xf32>
    %197 = arith.divf %195, %196 : vector<16x128xf32>
    %198 = vector.extract_strided_slice %191 {offsets = [0, 128], sizes = [16, 128], strides = [1, 1]} : vector<16x512xf32> to vector<16x128xf32>
    %199 = arith.negf %198 : vector<16x128xf32>
    %200 = math.exp %199 : vector<16x128xf32>
    %cst_44 = arith.constant 1.000000e+00 : f32
    %201 = vector.broadcast %cst_44 : f32 to vector<16x128xf32>
    %202 = arith.addf %201, %200 : vector<16x128xf32>
    %203 = arith.divf %201, %202 : vector<16x128xf32>
    %204 = vector.extract_strided_slice %191 {offsets = [0, 256], sizes = [16, 128], strides = [1, 1]} : vector<16x512xf32> to vector<16x128xf32>
    %205 = math.tanh %204 : vector<16x128xf32>
    %206 = vector.extract_strided_slice %191 {offsets = [0, 384], sizes = [16, 128], strides = [1, 1]} : vector<16x512xf32> to vector<16x128xf32>
    %207 = arith.negf %206 : vector<16x128xf32>
    %208 = math.exp %207 : vector<16x128xf32>
    %cst_45 = arith.constant 1.000000e+00 : f32
    %209 = vector.broadcast %cst_45 : f32 to vector<16x128xf32>
    %210 = arith.addf %209, %208 : vector<16x128xf32>
    %211 = arith.divf %209, %210 : vector<16x128xf32>
    %212 = arith.mulf %203, %186 : vector<16x128xf32>
    %213 = arith.mulf %197, %205 : vector<16x128xf32>
    %214 = arith.addf %212, %213 : vector<16x128xf32>
    %215 = math.tanh %214 : vector<16x128xf32>
    %216 = arith.mulf %211, %215 : vector<16x128xf32>
    %217 = vector.extract_strided_slice %17 {offsets = [112, 0], sizes = [16, 512], strides = [1, 1]} : vector<128x512xf32> to vector<16x512xf32>
    %cst_46 = arith.constant dense<0.000000e+00> : vector<16x512xf32>
    %218 = tpu.matmul %216, %18, %cst_46 {dimension_numbers = #tpu.dot_dimension_numbers<[1], [0], [0], [1], [0, 0, 1, 1], [], []>} : vector<16x128xf32>, vector<128x512xf32>, vector<16x512xf32> -> vector<16x512xf32>
    %219 = arith.addf %217, %218 : vector<16x512xf32>
    %220 = vector.extract_strided_slice %219 {offsets = [0, 0], sizes = [16, 128], strides = [1, 1]} : vector<16x512xf32> to vector<16x128xf32>
    %221 = arith.negf %220 : vector<16x128xf32>
    %222 = math.exp %221 : vector<16x128xf32>
    %cst_47 = arith.constant 1.000000e+00 : f32
    %223 = vector.broadcast %cst_47 : f32 to vector<16x128xf32>
    %224 = arith.addf %223, %222 : vector<16x128xf32>
    %225 = arith.divf %223, %224 : vector<16x128xf32>
    %226 = vector.extract_strided_slice %219 {offsets = [0, 128], sizes = [16, 128], strides = [1, 1]} : vector<16x512xf32> to vector<16x128xf32>
    %227 = arith.negf %226 : vector<16x128xf32>
    %228 = math.exp %227 : vector<16x128xf32>
    %cst_48 = arith.constant 1.000000e+00 : f32
    %229 = vector.broadcast %cst_48 : f32 to vector<16x128xf32>
    %230 = arith.addf %229, %228 : vector<16x128xf32>
    %231 = arith.divf %229, %230 : vector<16x128xf32>
    %232 = vector.extract_strided_slice %219 {offsets = [0, 256], sizes = [16, 128], strides = [1, 1]} : vector<16x512xf32> to vector<16x128xf32>
    %233 = math.tanh %232 : vector<16x128xf32>
    %234 = vector.extract_strided_slice %219 {offsets = [0, 384], sizes = [16, 128], strides = [1, 1]} : vector<16x512xf32> to vector<16x128xf32>
    %235 = arith.negf %234 : vector<16x128xf32>
    %236 = math.exp %235 : vector<16x128xf32>
    %cst_49 = arith.constant 1.000000e+00 : f32
    %237 = vector.broadcast %cst_49 : f32 to vector<16x128xf32>
    %238 = arith.addf %237, %236 : vector<16x128xf32>
    %239 = arith.divf %237, %238 : vector<16x128xf32>
    %240 = arith.mulf %231, %214 : vector<16x128xf32>
    %241 = arith.mulf %225, %233 : vector<16x128xf32>
    %242 = arith.addf %240, %241 : vector<16x128xf32>
    %243 = math.tanh %242 : vector<16x128xf32>
    %244 = arith.mulf %239, %243 : vector<16x128xf32>
    %245 = vector.extract_strided_slice %244 {offsets = [0, 0], sizes = [1, 128], strides = [1, 1]} : vector<16x128xf32> to vector<1x128xf32>
    %c0_50 = arith.constant 0 : index
    %c0_51 = arith.constant 0 : index
    %246 = vector.load %arg10[%c0_50, %c0_51] : memref<2x896xf32, #tpu.memory_space<vmem>>, vector<1x128xf32>
    tpu.vector_store %arg10[%c0_50, %c0_51], %245 {strides = array<i32>} : memref<2x896xf32, #tpu.memory_space<vmem>>, vector<1x128xf32>,
    %247 = vector.extract_strided_slice %244 {offsets = [1, 0], sizes = [1, 128], strides = [1, 1]} : vector<16x128xf32> to vector<1x128xf32>
    %c0_52 = arith.constant 0 : index
    %c128 = arith.constant 128 : index
    %248 = vector.load %arg10[%c0_52, %c128] : memref<2x896xf32, #tpu.memory_space<vmem>>, vector<1x128xf32>
    tpu.vector_store %arg10[%c0_52, %c128], %247 {strides = array<i32>} : memref<2x896xf32, #tpu.memory_space<vmem>>, vector<1x128xf32>,
    %249 = vector.extract_strided_slice %244 {offsets = [2, 0], sizes = [1, 128], strides = [1, 1]} : vector<16x128xf32> to vector<1x128xf32>
    %c0_53 = arith.constant 0 : index
    %c256 = arith.constant 256 : index
    %250 = vector.load %arg10[%c0_53, %c256] : memref<2x896xf32, #tpu.memory_space<vmem>>, vector<1x128xf32>
    tpu.vector_store %arg10[%c0_53, %c256], %249 {strides = array<i32>} : memref<2x896xf32, #tpu.memory_space<vmem>>, vector<1x128xf32>,
    %251 = vector.extract_strided_slice %244 {offsets = [3, 0], sizes = [1, 128], strides = [1, 1]} : vector<16x128xf32> to vector<1x128xf32>
    %c0_54 = arith.constant 0 : index
    %c384 = arith.constant 384 : index
    %252 = vector.load %arg10[%c0_54, %c384] : memref<2x896xf32, #tpu.memory_space<vmem>>, vector<1x128xf32>
    tpu.vector_store %arg10[%c0_54, %c384], %251 {strides = array<i32>} : memref<2x896xf32, #tpu.memory_space<vmem>>, vector<1x128xf32>,
    %253 = vector.extract_strided_slice %244 {offsets = [4, 0], sizes = [1, 128], strides = [1, 1]} : vector<16x128xf32> to vector<1x128xf32>
    %c0_55 = arith.constant 0 : index
    %c512 = arith.constant 512 : index
    %254 = vector.load %arg10[%c0_55, %c512] : memref<2x896xf32, #tpu.memory_space<vmem>>, vector<1x128xf32>
    tpu.vector_store %arg10[%c0_55, %c512], %253 {strides = array<i32>} : memref<2x896xf32, #tpu.memory_space<vmem>>, vector<1x128xf32>,
    %255 = vector.extract_strided_slice %244 {offsets = [5, 0], sizes = [1, 128], strides = [1, 1]} : vector<16x128xf32> to vector<1x128xf32>
    %c0_56 = arith.constant 0 : index
    %c640 = arith.constant 640 : index
    %256 = vector.load %arg10[%c0_56, %c640] : memref<2x896xf32, #tpu.memory_space<vmem>>, vector<1x128xf32>
    tpu.vector_store %arg10[%c0_56, %c640], %255 {strides = array<i32>} : memref<2x896xf32, #tpu.memory_space<vmem>>, vector<1x128xf32>,
    %257 = vector.extract_strided_slice %244 {offsets = [6, 0], sizes = [1, 128], strides = [1, 1]} : vector<16x128xf32> to vector<1x128xf32>
    %c0_57 = arith.constant 0 : index
    %c768 = arith.constant 768 : index
    %258 = vector.load %arg10[%c0_57, %c768] : memref<2x896xf32, #tpu.memory_space<vmem>>, vector<1x128xf32>
    tpu.vector_store %arg10[%c0_57, %c768], %257 {strides = array<i32>} : memref<2x896xf32, #tpu.memory_space<vmem>>, vector<1x128xf32>,
    %259 = vector.extract_strided_slice %244 {offsets = [7, 0], sizes = [1, 128], strides = [1, 1]} : vector<16x128xf32> to vector<1x128xf32>
    %c1 = arith.constant 1 : index
    %c0_58 = arith.constant 0 : index
    %260 = vector.load %arg10[%c1, %c0_58] : memref<2x896xf32, #tpu.memory_space<vmem>>, vector<1x128xf32>
    tpu.vector_store %arg10[%c1, %c0_58], %259 {strides = array<i32>} : memref<2x896xf32, #tpu.memory_space<vmem>>, vector<1x128xf32>,
    %261 = vector.extract_strided_slice %244 {offsets = [8, 0], sizes = [1, 128], strides = [1, 1]} : vector<16x128xf32> to vector<1x128xf32>
    %c1_59 = arith.constant 1 : index
    %c128_60 = arith.constant 128 : index
    %262 = vector.load %arg10[%c1_59, %c128_60] : memref<2x896xf32, #tpu.memory_space<vmem>>, vector<1x128xf32>
    tpu.vector_store %arg10[%c1_59, %c128_60], %261 {strides = array<i32>} : memref<2x896xf32, #tpu.memory_space<vmem>>, vector<1x128xf32>,
    %263 = vector.extract_strided_slice %244 {offsets = [9, 0], sizes = [1, 128], strides = [1, 1]} : vector<16x128xf32> to vector<1x128xf32>
    %c1_61 = arith.constant 1 : index
    %c256_62 = arith.constant 256 : index
    %264 = vector.load %arg10[%c1_61, %c256_62] : memref<2x896xf32, #tpu.memory_space<vmem>>, vector<1x128xf32>
    tpu.vector_store %arg10[%c1_61, %c256_62], %263 {strides = array<i32>} : memref<2x896xf32, #tpu.memory_space<vmem>>, vector<1x128xf32>,
    %265 = vector.extract_strided_slice %244 {offsets = [10, 0], sizes = [1, 128], strides = [1, 1]} : vector<16x128xf32> to vector<1x128xf32>
    %c1_63 = arith.constant 1 : index
    %c384_64 = arith.constant 384 : index
    %266 = vector.load %arg10[%c1_63, %c384_64] : memref<2x896xf32, #tpu.memory_space<vmem>>, vector<1x128xf32>
    tpu.vector_store %arg10[%c1_63, %c384_64], %265 {strides = array<i32>} : memref<2x896xf32, #tpu.memory_space<vmem>>, vector<1x128xf32>,
    %267 = vector.extract_strided_slice %244 {offsets = [11, 0], sizes = [1, 128], strides = [1, 1]} : vector<16x128xf32> to vector<1x128xf32>
    %c1_65 = arith.constant 1 : index
    %c512_66 = arith.constant 512 : index
    %268 = vector.load %arg10[%c1_65, %c512_66] : memref<2x896xf32, #tpu.memory_space<vmem>>, vector<1x128xf32>
    tpu.vector_store %arg10[%c1_65, %c512_66], %267 {strides = array<i32>} : memref<2x896xf32, #tpu.memory_space<vmem>>, vector<1x128xf32>,
    %269 = vector.extract_strided_slice %244 {offsets = [12, 0], sizes = [1, 128], strides = [1, 1]} : vector<16x128xf32> to vector<1x128xf32>
    %c1_67 = arith.constant 1 : index
    %c640_68 = arith.constant 640 : index
    %270 = vector.load %arg10[%c1_67, %c640_68] : memref<2x896xf32, #tpu.memory_space<vmem>>, vector<1x128xf32>
    tpu.vector_store %arg10[%c1_67, %c640_68], %269 {strides = array<i32>} : memref<2x896xf32, #tpu.memory_space<vmem>>, vector<1x128xf32>,
    %271 = vector.extract_strided_slice %244 {offsets = [13, 0], sizes = [1, 128], strides = [1, 1]} : vector<16x128xf32> to vector<1x128xf32>
    %c1_69 = arith.constant 1 : index
    %c768_70 = arith.constant 768 : index
    %272 = vector.load %arg10[%c1_69, %c768_70] : memref<2x896xf32, #tpu.memory_space<vmem>>, vector<1x128xf32>
    tpu.vector_store %arg10[%c1_69, %c768_70], %271 {strides = array<i32>} : memref<2x896xf32, #tpu.memory_space<vmem>>, vector<1x128xf32>,
    %c0_71 = arith.constant 0 : index
    %c0_72 = arith.constant 0 : index
    %273 = vector.load %arg10[%c0_71, %c0_72] : memref<2x896xf32, #tpu.memory_space<vmem>>, vector<2x896xf32>
    %c0_73 = arith.constant 0 : index
    %c0_74 = arith.constant 0 : index
    %274 = vector.load %arg7[%c0_73, %c0_74] : memref<896x3xf32, #tpu.memory_space<vmem>>, vector<896x3xf32>
    %cst_75 = arith.constant dense<0.000000e+00> : vector<2x3xf32>
    %275 = tpu.matmul %273, %274, %cst_75 {dimension_numbers = #tpu.dot_dimension_numbers<[1], [0], [0], [1], [0, 0, 1, 1], [], []>} : vector<2x896xf32>, vector<896x3xf32>, vector<2x3xf32> -> vector<2x3xf32>
    %c0_76 = arith.constant 0 : index
    %c0_77 = arith.constant 0 : index
    %276 = vector.load %arg8[%c0_76, %c0_77] : memref<1x3xf32, #tpu.memory_space<vmem>>, vector<1x3xf32>
    %277 = vector.broadcast %276 : vector<1x3xf32> to vector<2x3xf32>
    %278 = arith.addf %275, %277 : vector<2x3xf32>
    %279 = arith.negf %278 : vector<2x3xf32>
    %280 = math.exp %279 : vector<2x3xf32>
    %cst_78 = arith.constant 1.000000e+00 : f32
    %281 = vector.broadcast %cst_78 : f32 to vector<2x3xf32>
    %282 = arith.addf %281, %280 : vector<2x3xf32>
    %283 = arith.divf %281, %282 : vector<2x3xf32>
    %c0_79 = arith.constant 0 : index
    %c0_80 = arith.constant 0 : index
    %284 = vector.load %arg9[%c0_79, %c0_80] : memref<2x3xf32, #tpu.memory_space<vmem>>, vector<2x3xf32>
    tpu.vector_store %arg9[%c0_79, %c0_80], %283 {strides = array<i32>} : memref<2x3xf32, #tpu.memory_space<vmem>>, vector<2x3xf32>,
    return
  }
}

</mosaic_0001>

<bundles_post_ra>
// kernel: my_model_forward.1
= control target key start
LH: loop header
LB: loop body
LE: loop exit
PB: predicated region body
PF: predicated region fallthrough
CT: control target
= control target key end

     0   :  { %vm91_vm0 = vcmask 1043456   ;;  %vm48_vm1 = vcmask 31744   ;;  %s6223_s0 = inlined_call_operand.vmem [shape: f32[112,4], index: 0, kind: input, shape index: {}]   ;;  %s6224_s1 = inlined_call_operand.vmem [shape: f32[128,112], index: 1, kind: input, shape index: {}]   ;;  %s6225_s2 = inlined_call_operand.vmem [shape: f32[4,32], index: 2, kind: input, shape index: {}]   ;;  %s6226_s3 = inlined_call_operand.vmem [shape: f32[1,32], index: 3, kind: input, shape index: {}]   ;;  %s6227_s4 = inlined_call_operand.vmem [shape: f32[32,512], index: 4, kind: input, shape index: {}]   ;;  %s6228_s5 = inlined_call_operand.vmem [shape: f32[128,512], index: 5, kind: input, shape index: {}]   ;;  %s6229_s6 = inlined_call_operand.vmem [shape: f32[1,512], index: 6, kind: input, shape index: {}]   ;;  %s6230_s7 = inlined_call_operand.vmem [shape: f32[896,3], index: 7, kind: input, shape index: {}]   ;;  %s6231_s8 = inlined_call_operand.vmem [shape: f32[1,3], index: 8, kind: input, shape index: {}]   ;;  %s6232_s9 = inlined_call_operand.hbm [shape: f32[2,3], index: 9, kind: output, shape index: {}]  }
   0x1   :  { %v47_v0 = vld [vmem:[%s6225_s2] sm:$0xf]  ;;  %v34_v2 = vld [vmem:[%s6223_s0 + $0x8] sm:$0xff]  ;;  %v35_v3 = vld [vmem:[%s6223_s0 + $0x10] sm:$0xff] }
   0x2   :  { %v33_v1 = vld [vmem:[%s6223_s0] sm:$0xff]  ;;  %3542 = vmatprep.subr.msk.mxu0 %vm91_vm0, %v47_v0  ;;  %v36_v4 = vld [vmem:[%s6223_s0 + $0x18] sm:$0xff] }
   0x3   :  { %3544 = vmatprep.mubr.msk.f32.mxu0 %vm48_vm1, %v33_v1  ;;  %3543 = vmatpush3.msk.msra.mxu0 %vm91_vm0, %v47_v0  ;;  %v37_v5 = vld [vmem:[%s6223_s0 + $0x20] sm:$0xff] }
   0x4   :  { %3545 = vmatmul.mubr.msk.f32.vlgmr.msra.gmra.mrb[0].mxu0 %vm48_vm1, %v34_v2 }
   0x5   :  { %3547 = vmatprep.mubr.msk.f32.mxu0 %vm48_vm1, %v35_v3 }
   0x6   :  { %14 = vsyncpa [#allocation4], 0  ;;  %v38_v6 = vld [vmem:[%s6223_s0 + $0x28] sm:$0xff]  ;;  %v39_v7 = vld [vmem:[%s6223_s0 + $0x30] sm:$0xff]  ;;  %vm253_vm2 = vcmask 916480   ;;  %vm581_vm3 = vcmask 261120  }
   0x7   :  { %v40_v8 = vld [vmem:[%s6223_s0 + $0x38] sm:$0xff]  ;;  %v41_v9 = vld [vmem:[%s6223_s0 + $0x40] sm:$0xff]  ;;  %v42_v10 = vld [vmem:[%s6223_s0 + $0x48] sm:$0xff]  ;;  %vm4828_vm4 = vmmov 0   ;;  %vm3220_vm5 = vcmask 17408  }
   0x8   :  { %3548 = vmatmul.mubr.msk.f32.gmra.mrb[2].mxu0 %vm48_vm1, %v36_v4  ;;  %v43_v11 = vld [vmem:[%s6223_s0 + $0x50] sm:$0xff]  ;;  %v44_v12 = vld [vmem:[%s6223_s0 + $0x58] sm:$0xff]  ;;  %v45_v13 = vld [vmem:[%s6223_s0 + $0x60] sm:$0xff] }
   0x9   :  { %3550 = vmatprep.mubr.msk.f32.mxu0 %vm48_vm1, %v37_v5  ;;  %v46_v14 = vld [vmem:[%s6223_s0 + $0x68] sm:$0xff]  ;;  %v230_v15 = vld [vmem:[%s6224_s1] sm:$0xff]  ;;  %v236_v16 = vld [vmem:[%s6224_s1 + $0x30] sm:$0xff] }
   0xa   :  { %3602 = vmatprep.mubr.msk.f32.mxu1 %vm253_vm2, %v236_v16  ;;  %v231_v38 = vld [vmem:[%s6224_s1 + $0x8] sm:$0xff]  ;;  %v237_v39 = vld [vmem:[%s6224_s1 + $0x38] sm:$0xff]  ;;  %v232_v40 = vld [vmem:[%s6224_s1 + $0x10] sm:$0xff] }
   0xb   :  { %v238_v41 = vld [vmem:[%s6224_s1 + $0x40] sm:$0xff]  ;;  %v233_v42 = vld [vmem:[%s6224_s1 + $0x18] sm:$0xff]  ;;  %v239_v43 = vld [vmem:[%s6224_s1 + $0x48] sm:$0xff] }
   0xc   :  { %3551 = vmatmul.mubr.msk.f32.gmra.mrb[4].mxu0 %vm48_vm1, %v38_v6  ;;  %v234_v44 = vld [vmem:[%s6224_s1 + $0x20] sm:$0xff]  ;;  %v240_v45 = vld [vmem:[%s6224_s1 + $0x50] sm:$0xff]  ;;  %v235_v46 = vld [vmem:[%s6224_s1 + $0x28] sm:$0xff] }
   0xd   :  { %3553 = vmatprep.mubr.msk.f32.mxu0 %vm48_vm1, %v39_v7  ;;  %v241_v47 = vld [vmem:[%s6224_s1 + $0x58] sm:$0xff]  ;;  %v242_v48 = vld [vmem:[%s6224_s1 + $0x60] sm:$0xff]  ;;  %v243_v49 = vld [vmem:[%s6224_s1 + $0x68] sm:$0xff] }
   0xe   :  { %v244_v50 = vld [vmem:[%s6224_s1 + $0x70] sm:$0xff]  ;;  %v245_v51 = vld [vmem:[%s6224_s1 + $0x78] sm:$0xff]  ;;  %v544_v52 = vld [vmem:[%s6227_s4 + $0x8] sm:$0xff] }
   0xf   :  { %v548_v53 = vld [vmem:[%s6227_s4 + $0x28] sm:$0xff]  ;;  %v546_v54 = vld [vmem:[%s6227_s4 + $0x18] sm:$0xff]  ;;  %v543_v56 = vld [vmem:[%s6227_s4] sm:$0xff] }
  0x10   :  { %3554 = vmatmul.mubr.msk.f32.gmra.mrb[6].mxu0 %vm48_vm1, %v40_v8  ;;  %v3680_v55 = vpack.c.bf16 %v548_v53, %v544_v52  ;;  %v547_v57 = vld [vmem:[%s6227_s4 + $0x20] sm:$0xff]  ;;  %v550_v58 = vld [vmem:[%s6227_s4 + $0x38] sm:$0xff]  ;;  %v545_v61 = vld [vmem:[%s6227_s4 + $0x10] sm:$0xff] }
  0x11   :  { %3556 = vmatprep.mubr.msk.f32.mxu0 %vm48_vm1, %v41_v9  ;;  %v3682_v59 = vpack.c.bf16 %v547_v57, %v543_v56  ;;  %v3688_v60 = vpack.c.bf16 %v550_v58, %v546_v54  ;;  %v549_v62 = vld [vmem:[%s6227_s4 + $0x30] sm:$0xff]  ;;  %v552_v0 = vld [vmem:[%s6227_s4 + $0x48] sm:$0xff]  ;;  %v554_v2 = vld [vmem:[%s6227_s4 + $0x58] sm:$0xff] }
  0x12   :  { %v3690_v63 = vpack.c.bf16 %v549_v62, %v545_v61  ;;  %v556_v1 = vld [vmem:[%s6227_s4 + $0x68] sm:$0xff]  ;;  %v551_v4 = vld [vmem:[%s6227_s4 + $0x40] sm:$0xff]  ;;  %v558_v6 = vld [vmem:[%s6227_s4 + $0x78] sm:$0xff] }
  0x13   :  { %v3684_v3 = vpack.c.bf16 %v556_v1, %v552_v0  ;;  %v555_v5 = vld [vmem:[%s6227_s4 + $0x60] sm:$0xff]  ;;  %v3692_v8 = vpack.c.bf16 %v558_v6, %v554_v2  ;;  %v553_v9 = vld [vmem:[%s6227_s4 + $0x50] sm:$0xff]  ;;  %v955_v16 = vld [vmem:[%s6228_s5 + $0x18] sm:$0xff] }
  0x14   :  { %3557 = vmatmul.mubr.msk.f32.gmra.mrb[8].mxu0 %vm48_vm1, %v42_v10  ;;  %v3686_v7 = vpack.c.bf16 %v555_v5, %v551_v4  ;;  %v557_v10 = vld [vmem:[%s6227_s4 + $0x70] sm:$0xff]  ;;  %v952_v58 = vld [vmem:[%s6228_s5] sm:$0xff]  ;;  %v961_v61 = vld [vmem:[%s6228_s5 + $0x48] sm:$0xff] }
  0x15   :  { %3559 = vmatprep.mubr.msk.f32.mxu0 %vm48_vm1, %v43_v11  ;;  %v3694_v11 = vpack.c.bf16 %v557_v10, %v553_v9  ;;  %v965_v62 = vld [vmem:[%s6228_s5 + $0x68] sm:$0xff]  ;;  %v954_v1 = vld [vmem:[%s6228_s5 + $0x10] sm:$0xff] }
  0x16   :  { %v958_v2 = vld [vmem:[%s6228_s5 + $0x30] sm:$0xff]  ;;  %v5119_v6 = vpack.c.bf16 %v965_v62, %v961_v61 }
  0x17   :  { %v982_v61 = vld [vmem:[%s6228_s5 + $0xf0] sm:$0xff] }
  0x18   :  { %3560 = vmatmul.mubr.msk.f32.gmra.mrb[10].mxu0 %vm48_vm1, %v44_v12  ;;  %v4825_v12 = vmov 0.0  }
  0x19   :  { %3562 = vmatprep.mubr.msk.f32.mxu0 %vm48_vm1, %v45_v13  ;;  %v953_v13 = vld [vmem:[%s6228_s5 + $0x8] sm:$0xff] }
  0x1c   :  { %3563 = vmatmul.mubr.msk.f32.gmra.mrb[12].mxu0 %vm48_vm1, %v46_v14  ;;  %v957_v14 = vld [vmem:[%s6228_s5 + $0x28] sm:$0xff] }
  0x1d   :  { %3593 = vmatprep.mubr.msk.f32.mxu0 %vm253_vm2, %v230_v15  ;;  %v5059_v15 = vpack.c.bf16 %v957_v14, %v953_v13  ;;  %v5130_v13 = vpack.c.bf16 %v958_v2, %v954_v1  ;;  %v963_v14 = vld [vmem:[%s6228_s5 + $0x58] sm:$0xff]  ;;  %v988_v1 = vld [vmem:[%s6228_s5 + $0x120] sm:$0xff] }
  0xd7   :  { %v3546_v17 = vpop.f32.mrb[0].mxu0 }
  0xd8   :  { %v161_v18 = vpop.f32.mrb[1].mxu0 }
  0xd9   :  { %v3652_v19 = vpack.c.bf16 %v3546_v17, %v161_v18  ;;  %v959_v17 = vld [vmem:[%s6228_s5 + $0x38] sm:$0xff] }
  0xda   :  { %v5068_v18 = vpack.c.bf16 %v959_v17, %v955_v16  ;;  %v967_v16 = vld [vmem:[%s6228_s5 + $0x78] sm:$0xff] }
  0xdb   :  { %v3549_v20 = vpop.f32.mrb[2].mxu0  ;;  %3653 = vmatprep.subr.bf16.mxu0 %v3652_v19  ;;  %4328 = vmatprep.subr.bf16.mxu1 %v3652_v19 }
  0xdc   :  { %v171_v21 = vpop.f32.mrb[3].mxu0  ;;  %3655 = vmatpush3.bf16.msra.mxu0 %v3652_v19  ;;  %4335 = vmatpush3.bf16.msra.mxu1 %v3652_v19  ;;  %v5074_v19 = vld [vmem:[%s6226_s3] ss:$0 sm:$0xff] }
  0xdd   :  { %v3656_v22 = vpack.c.bf16 %v3549_v20, %v171_v21 }
  0xdf   :  { %v3552_v23 = vpop.f32.mrb[4].mxu0  ;;  %3657 = vmatprep.subr.bf16.mxu0 %v3656_v22  ;;  %4329 = vmatprep.subr.bf16.mxu1 %v3656_v22 }
  0xe0   :  { %v181_v24 = vpop.f32.mrb[5].mxu0  ;;  %3659 = vmatpush3.bf16.msra.mxu0 %v3656_v22  ;;  %4336 = vmatpush3.bf16.msra.mxu1 %v3656_v22 }
  0xe1   :  { %v3660_v25 = vpack.c.bf16 %v3552_v23, %v181_v24 }
  0xe3   :  { %v3555_v26 = vpop.f32.mrb[6].mxu0  ;;  %3661 = vmatprep.subr.bf16.mxu0 %v3660_v25  ;;  %4330 = vmatprep.subr.bf16.mxu1 %v3660_v25 }
  0xe4   :  { %v191_v27 = vpop.f32.mrb[7].mxu0  ;;  %3663 = vmatpush3.bf16.msra.mxu0 %v3660_v25  ;;  %4337 = vmatpush3.bf16.msra.mxu1 %v3660_v25 }
  0xe5   :  { %v3664_v28 = vpack.c.bf16 %v3555_v26, %v191_v27 }
  0xe7   :  { %v3558_v29 = vpop.f32.mrb[8].mxu0  ;;  %3665 = vmatprep.subr.bf16.mxu0 %v3664_v28  ;;  %4331 = vmatprep.subr.bf16.mxu1 %v3664_v28 }
  0xe8   :  { %v201_v30 = vpop.f32.mrb[9].mxu0  ;;  %3667 = vmatpush3.bf16.msra.mxu0 %v3664_v28  ;;  %4338 = vmatpush3.bf16.msra.mxu1 %v3664_v28 }
  0xe9   :  { %v3668_v31 = vpack.c.bf16 %v3558_v29, %v201_v30 }
  0xeb   :  { %v3561_v32 = vpop.f32.mrb[10].mxu0  ;;  %3669 = vmatprep.subr.bf16.mxu0 %v3668_v31  ;;  %4332 = vmatprep.subr.bf16.mxu1 %v3668_v31 }
  0xec   :  { %v211_v33 = vpop.f32.mrb[11].mxu0  ;;  %3671 = vmatpush3.bf16.msra.mxu0 %v3668_v31  ;;  %4339 = vmatpush3.bf16.msra.mxu1 %v3668_v31 }
  0xed   :  { %v3672_v34 = vpack.c.bf16 %v3561_v32, %v211_v33 }
  0xef   :  { %v3564_v35 = vpop.f32.mrb[12].mxu0  ;;  %3673 = vmatprep.subr.bf16.mxu0 %v3672_v34  ;;  %4333 = vmatprep.subr.bf16.mxu1 %v3672_v34 }
  0xf0   :  { %v221_v36 = vpop.f32.mrb[13].mxu0  ;;  %3675 = vmatpush3.bf16.msra.mxu0 %v3672_v34  ;;  %4340 = vmatpush3.bf16.msra.mxu1 %v3672_v34 }
  0xf1   :  { %v3676_v37 = vpack.c.bf16 %v3564_v35, %v221_v36 }
  0xf3   :  { %3677 = vmatprep.subr.bf16.mxu0 %v3676_v37  ;;  %4334 = vmatprep.subr.bf16.mxu1 %v3676_v37 }
  0xf4   :  { %3679 = vmatpush3.bf16.msra.mxu0 %v3676_v37  ;;  %4341 = vmatpush3.bf16.msra.mxu1 %v3676_v37 }
  0xf5   :  { %3681 = vmatprep.subr.bf16.mxu0 %v3680_v55  ;;  %3689 = vmatprep.subr.bf16.mxu1 %v3688_v60 }
  0xf7   :  { %3594 = vmatmul.mubr.msk.f32.vlgmr.msra.gmra.mrb[14].mxu0 %vm253_vm2, %v231_v38  ;;  %3603 = vmatmul.mubr.msk.f32.vlgmr.msra.gmra.mrb[0].mxu1 %vm253_vm2, %v237_v39 }
  0xf8   :  { %3596 = vmatprep.mubr.msk.f32.mxu0 %vm253_vm2, %v232_v40  ;;  %3605 = vmatprep.mubr.msk.f32.mxu1 %vm253_vm2, %v238_v41 }
  0xf9   :  { %3683 = vmatpush1.bf16.msra.mxu0 %v3682_v59  ;;  %3691 = vmatpush1.bf16.msra.mxu1 %v3690_v63  ;;  %v956_v59 = vld [vmem:[%s6228_s5 + $0x20] sm:$0xff] }
  0xfa   :  { %3685 = vmatprep.subr.bf16.mxu0 %v3684_v3  ;;  %3693 = vmatprep.subr.bf16.mxu1 %v3692_v8  ;;  %v5117_v4 = vpack.c.bf16 %v956_v59, %v952_v58  ;;  %v964_v8 = vld [vmem:[%s6228_s5 + $0x60] sm:$0xff]  ;;  %v989_v59 = vld [vmem:[%s6228_s5 + $0x128] sm:$0xff] }
  0xfb   :  { %3597 = vmatmul.mubr.msk.f32.gmra.mrb[16].mxu0 %vm253_vm2, %v233_v42  ;;  %3606 = vmatmul.mubr.msk.f32.gmra.mrb[2].mxu1 %vm253_vm2, %v239_v43 }
  0xfc   :  { %3599 = vmatprep.mubr.msk.f32.mxu0 %vm253_vm2, %v234_v44  ;;  %3608 = vmatprep.mubr.msk.f32.mxu1 %vm253_vm2, %v240_v45 }
  0xfd   :  { %3687 = vmatpush1.bf16.msra.mxu0 %v3686_v7  ;;  %3695 = vmatpush1.bf16.msra.mxu1 %v3694_v11  ;;  %v960_v7 = vld [vmem:[%s6228_s5 + $0x40] sm:$0xff]  ;;  %v969_v11 = vld [vmem:[%s6228_s5 + $0x88] sm:$0xff] }
  0xfe   :  { %3697 = vmatprep.subr.bf16.mxu0 %v5059_v15  ;;  %3729 = vmatprep.subr.bf16.mxu1 %v5068_v18 }
  0xff   :  { %3600 = vmatmul.mubr.msk.f32.gmra.mrb[18].mxu0 %vm253_vm2, %v235_v46  ;;  %3609 = vmatmul.mubr.msk.f32.gmra.mrb[4].mxu1 %vm253_vm2, %v241_v47 }
 0x100   :  { %3611 = vmatprep.mubr.msk.f32.mxu1 %vm253_vm2, %v242_v48  ;;  %694 = vmatprep.mubr.f32.mxu0 %v4825_v12 }
 0x103   :  { %3612 = vmatmul.mubr.msk.f32.gmra.mrb[6].mxu1 %vm253_vm2, %v243_v49 }
 0x104   :  { %3614 = vmatprep.mubr.msk.f32.mxu1 %vm253_vm2, %v244_v50 }
 0x107   :  { %3615 = vmatmul.mubr.msk.f32.gmra.mrb[8].mxu1 %vm253_vm2, %v245_v51 }
 0x108   :  { %855 = vmatprep.mubr.f32.mxu1 %v4825_v12 }
 0x1ca   :  { %v3595_v20 = vpop.f32.mrb[14].mxu0  ;;  %v3604_v21 = vpop.f32.mrb[0].mxu1 }
 0x1cb   :  { %v374_v22 = vadd.f32 %v3595_v20, %v5074_v19  ;;  %v368_v23 = vpop.f32.mrb[15].mxu0  ;;  %v398_v24 = vpop.f32.mrb[1].mxu1  ;;  %v404_v56 = vadd.f32 %v3604_v21, %v5074_v19  ;;  %v973_v20 = vld [vmem:[%s6228_s5 + $0xa8] sm:$0xff]  ;;  %v962_v21 = vld [vmem:[%s6228_s5 + $0x50] sm:$0xff] }
 0x1cc   :  { %v369_v25 = vadd.f32 %v5074_v19, %v368_v23  ;;  %v399_v47 = vadd.f32 %v5074_v19, %v398_v24  ;;  %v5155_v24 = vpack.c.bf16 %v964_v8, %v960_v7  ;;  %v987_v8 = vld [vmem:[%s6228_s5 + $0x118] sm:$0xff] }
 0x1cd   :  { %v3269_v26 = vmul.f32 -1.442695, %v374_v22  ;;  %v3275_v0 = vmul.f32 -1.442695, %v404_v56  ;;  %v966_v22 = vld [vmem:[%s6228_s5 + $0x70] sm:$0xff]  ;;  %v979_v56 = vld [vmem:[%s6228_s5 + $0xd8] sm:$0xff] }
 0x1ce   :  { %v3268_v27 = vmul.f32 -1.442695, %v369_v25  ;;  %v3598_v28 = vpop.f32.mrb[16].mxu0  ;;  %v5078_v29 = vpop.f32.mrb[2].mxu1  ;;  %v3274_v54 = vmul.f32 -1.442695, %v399_v47 }
 0x1cf   :  { %4477 = vpow2.f32 %v3269_v26  ;;  %v378_v30 = vpop.f32.mrb[17].mxu0  ;;  %v408_v31 = vpop.f32.mrb[3].mxu1  ;;  %v384_v32 = vadd.f32 %v3598_v28, %v5074_v19  ;;  %v414_v17 = vadd.f32 %v5078_v29, %v5074_v19  ;;  %v968_v26 = vld [vmem:[%s6228_s5 + $0x80] sm:$0xff]  ;;  %v5165_v28 = vpack.c.bf16 %v967_v16, %v963_v14  ;;  %v997_v14 = vld [vmem:[%s6228_s5 + $0x168] sm:$0xff]  ;;  %v986_v16 = vld [vmem:[%s6228_s5 + $0x110] sm:$0xff] }
 0x1d0   :  { %4479 = vpow2.f32 %v3268_v27  ;;  %v379_v33 = vadd.f32 %v5074_v19, %v378_v30  ;;  %v409_v60 = vadd.f32 %v5074_v19, %v408_v31  ;;  %v972_v27 = vld [vmem:[%s6228_s5 + $0xa0] sm:$0xff]  ;;  %v5167_v30 = vpack.c.bf16 %v973_v20, %v969_v11  ;;  %v977_v31 = vld [vmem:[%s6228_s5 + $0xc8] sm:$0xff] }
 0x1d1   :  { %v3271_v39 = vmul.f32 -1.442695, %v384_v32  ;;  %v5173_v32 = vpack.c.bf16 %v966_v22, %v962_v21  ;;  %v976_v47 = vld [vmem:[%s6228_s5 + $0xc0] sm:$0xff] }
 0x1d2   :  { %v3270_v34 = vmul.f32 -1.442695, %v379_v33  ;;  %v3601_v35 = vpop.f32.mrb[18].mxu0  ;;  %v5082_v36 = vpop.f32.mrb[4].mxu1  ;;  %v3276_v5 = vmul.f32 -1.442695, %v409_v60 }
 0x1d3   :  { %v388_v37 = vpop.f32.mrb[19].mxu0  ;;  %v5084_v38 = vpop.f32.mrb[5].mxu1  ;;  %v394_v44 = vadd.f32 %v3601_v35, %v5074_v19  ;;  %v971_v33 = vld [vmem:[%s6228_s5 + $0x98] sm:$0xff]  ;;  %v424_v58 = vadd.f32 %v5082_v36, %v5074_v19  ;;  %v978_v60 = vld [vmem:[%s6228_s5 + $0xd0] sm:$0xff] }
 0x1d4   :  { %4481 = vpow2.f32 %v3270_v34  ;;  %v389_v40 = vadd.f32 %v5074_v19, %v388_v37  ;;  %v419_v25 = vadd.f32 %v5074_v19, %v5084_v38  ;;  %v975_v34 = vld [vmem:[%s6228_s5 + $0xb8] sm:$0xff]  ;;  %v3277_v37 = vmul.f32 -1.442695, %v414_v17  ;;  %v981_v38 = vld [vmem:[%s6228_s5 + $0xe8] sm:$0xff]  ;;  %v990_v17 = vld [vmem:[%s6228_s5 + $0x130] sm:$0xff] }
 0x1d5   :  { %4483 = vpow2.f32 %v3271_v39  ;;  %v3273_v51 = vmul.f32 -1.442695, %v394_v44  ;;  %v970_v39 = vld [vmem:[%s6228_s5 + $0x90] sm:$0xff]  ;;  %v5257_v7 = vpack.c.bf16 %v982_v61, %v978_v60  ;;  %v3279_v11 = vmul.f32 -1.442695, %v424_v58  ;;  %v1007_v58 = vld [vmem:[%s6228_s5 + $0x1b8] sm:$0xff] }
 0x1d6   :  { %v3272_v41 = vmul.f32 -1.442695, %v389_v40  ;;  %v5087_v42 = vpop.f32.mrb[6].mxu1  ;;  %v974_v40 = vld [vmem:[%s6228_s5 + $0xb0] sm:$0xff] }
 0x1d7   :  { %v5089_v43 = vpop.f32.mrb[7].mxu1 }
 0x1d8   :  { %4485 = vpow2.f32 %v3272_v41  ;;  %v429_v36 = vadd.f32 %v5074_v19, %v5089_v43  ;;  %v993_v43 = vld [vmem:[%s6228_s5 + $0x148] sm:$0xff] }
 0x1d9   :  { %v4478_v45 = vpop.eup %4477 }
 0x1da   :  { %v4480_v46 = vpop.eup %4479  ;;  %v5093_v48 = vpop.f32.mrb[8].mxu1  ;;  %v496_v52 = vadd.f32 1.0, %v4478_v45  ;;  %v3278_v45 = vmul.f32 -1.442695, %v419_v25  ;;  %v3280_v22 = vmul.f32 -1.442695, %v429_v36 }
 0x1db   :  { %v495_v49 = vadd.f32 1.0, %v4480_v46  ;;  %v5095_v50 = vpop.f32.mrb[9].mxu1  ;;  %v5195_v46 = vpack.c.bf16 %v972_v27, %v968_v26  ;;  %v992_v25 = vld [vmem:[%s6228_s5 + $0x140] sm:$0xff]  ;;  %v1013_v36 = vld [vmem:[%s6228_s5 + $0x1e8] sm:$0xff] }
 0x1dc   :  { %v996_v26 = vld [vmem:[%s6228_s5 + $0x160] sm:$0xff] }
 0x1dd   :  { %4487 = vrcp.f32 %v495_v49  ;;  %v980_v49 = vld [vmem:[%s6228_s5 + $0xe0] sm:$0xff] }
 0x1de   :  { %v4482_v53 = vpop.eup %4481  ;;  %4489 = vpow2.f32 %v3273_v51  ;;  %v5204_v51 = vpack.c.bf16 %v975_v34, %v971_v33  ;;  %v1001_v33 = vld [vmem:[%s6228_s5 + $0x188] sm:$0xff]  ;;  %v5297_v34 = vpack.c.bf16 %v990_v17, %v986_v16  ;;  %v1012_v16 = vld [vmem:[%s6228_s5 + $0x1e0] sm:$0xff] }
 0x1df   :  { %v497_v55 = vadd.f32 1.0, %v4482_v53  ;;  %4491 = vrcp.f32 %v496_v52  ;;  %v4484_v57 = vpop.eup %4483  ;;  %v5207_v53 = vpack.c.bf16 %v981_v38, %v977_v31  ;;  %v5291_v31 = vpack.c.bf16 %v997_v14, %v993_v43 }
 0x1e0   :  { %4493 = vpow2.f32 %v3274_v54  ;;  %v498_v3 = vadd.f32 1.0, %v4484_v57  ;;  %v985_v54 = vld [vmem:[%s6228_s5 + $0x108] sm:$0xff]  ;;  %v983_v57 = vld [vmem:[%s6228_s5 + $0xf8] sm:$0xff]  ;;  %v434_v38 = vadd.f32 %v5087_v42, %v5074_v19  ;;  %v439_v42 = vadd.f32 %v5074_v19, %v5095_v50 }
 0x1e1   :  { %4495 = vrcp.f32 %v497_v55  ;;  %v5213_v55 = vpack.c.bf16 %v974_v40, %v970_v39  ;;  %v5248_v2 = vpack.c.bf16 %v983_v57, %v979_v56  ;;  %v1005_v39 = vld [vmem:[%s6228_s5 + $0x1a8] sm:$0xff]  ;;  %v994_v40 = vld [vmem:[%s6228_s5 + $0x150] sm:$0xff]  ;;  %v1003_v57 = vld [vmem:[%s6228_s5 + $0x198] sm:$0xff] }
 0x1e2   :  { %v4486_v63 = vpop.eup %4485  ;;  %4497 = vpow2.f32 %v3275_v0  ;;  %v984_v0 = vld [vmem:[%s6228_s5 + $0x100] sm:$0xff]  ;;  %v5335_v50 = vpack.c.bf16 %v1005_v39, %v1001_v33  ;;  %v3281_v61 = vmul.f32 -1.442695, %v434_v38  ;;  %v3282_v43 = vmul.f32 -1.442695, %v439_v42 }
 0x1e3   :  { %v499_v10 = vadd.f32 1.0, %v4486_v63  ;;  %4499 = vrcp.f32 %v498_v3  ;;  %v5239_v63 = vpack.c.bf16 %v980_v49, %v976_v47  ;;  %v1000_v47 = vld [vmem:[%s6228_s5 + $0x180] sm:$0xff] }
 0x1e4   :  { %4501 = vpow2.f32 %v3276_v5  ;;  %v5251_v5 = vpack.c.bf16 %v989_v59, %v985_v54  ;;  %v1004_v49 = vld [vmem:[%s6228_s5 + $0x1a0] sm:$0xff]  ;;  %v1002_v59 = vld [vmem:[%s6228_s5 + $0x190] sm:$0xff] }
 0x1e5   :  { %4503 = vrcp.f32 %v499_v10 }
 0x1e6   :  { %4505 = vpow2.f32 %v3277_v37  ;;  %v999_v37 = vld [vmem:[%s6228_s5 + $0x178] sm:$0xff] }
 0x1e7   :  { %v4488_v9 = vpop.eup %4487 }
 0x1e8   :  { %3284 = vmatmul.mubr.msk.f32.vlgmr.msra.gmra.mrb[20].mxu0 %vm581_vm3, %v4488_v9  ;;  %3300 = vmatmul.mubr.msk.f32.vlgmr.msra.gmra.mrb[10].mxu1 %vm581_vm3, %v4488_v9  ;;  %v4490_v23 = vpop.eup %4489  ;;  %v991_v9 = vld [vmem:[%s6228_s5 + $0x138] sm:$0xff] }
 0x1e9   :  { %3699 = vmatpush1.bf16.msra.mxu0 %v5117_v4  ;;  %700 = vmatprep.mubr.f32.mxu0 %v4825_v12  ;;  %v4492_v29 = vpop.eup %4491  ;;  %v500_v44 = vadd.f32 1.0, %v4490_v23  ;;  %v5279_v23 = vpack.c.bf16 %v988_v1, %v984_v0  ;;  %v5288_v27 = vpack.c.bf16 %v991_v9, %v987_v8  ;;  %v1006_v0 = vld [vmem:[%s6228_s5 + $0x1b0] sm:$0xff]  ;;  %v5363_v8 = vpack.c.bf16 %v1004_v49, %v1000_v47 }
 0x1ea   :  { %861 = vmatprep.mubr.f32.mxu1 %v4825_v12  ;;  %3701 = vmatprep.subr.bf16.mxu0 %v5119_v6  ;;  %v4494_v35 = vpop.eup %4493  ;;  %v5366_v9 = vpack.c.bf16 %v1007_v58, %v1003_v57  ;;  %v5378_v17 = vpack.c.bf16 %v1006_v0, %v1002_v59 }
 0x1eb   :  { %3731 = vmatpush1.bf16.msra.mxu1 %v5130_v13  ;;  %v4496_v41 = vpop.eup %4495  ;;  %v501_v52 = vadd.f32 1.0, %v4494_v35  ;;  %4507 = vrcp.f32 %v500_v44  ;;  %v995_v35 = vld [vmem:[%s6228_s5 + $0x158] sm:$0xff] }
 0x1ec   :  { %3285 = vmatmul.mubr.msk.f32.gmra.mrb[22].mxu0 %vm581_vm3, %v4492_v29  ;;  %3301 = vmatmul.mubr.msk.f32.gmra.mrb[12].mxu1 %vm581_vm3, %v4492_v29  ;;  %v4498_v62 = vpop.eup %4497  ;;  %4509 = vpow2.f32 %v3278_v45  ;;  %v5323_v45 = vpack.c.bf16 %v996_v26, %v992_v25  ;;  %v1010_v25 = vld [vmem:[%s6228_s5 + $0x1d0] sm:$0xff] }
 0x1ed   :  { %706 = vmatprep.mubr.f32.mxu0 %v4825_v12  ;;  %867 = vmatprep.mubr.f32.mxu1 %v4825_v12  ;;  %v4500_v3 = vpop.eup %4499  ;;  %4511 = vrcp.f32 %v501_v52  ;;  %v502_v21 = vadd.f32 1.0, %v4498_v62  ;;  %v5332_v52 = vpack.c.bf16 %v999_v37, %v995_v35  ;;  %v1009_v62 = vld [vmem:[%s6228_s5 + $0x1c8] sm:$0xff]  ;;  %v1014_v26 = vld [vmem:[%s6228_s5 + $0x1f0] sm:$0xff] }
 0x1ee   :  { %3703 = vmatpush1.bf16.msra.mxu0 %v5155_v24  ;;  %3733 = vmatprep.subr.bf16.mxu1 %v5165_v28  ;;  %v4502_v10 = vpop.eup %4501  ;;  %4513 = vpow2.f32 %v3279_v11  ;;  %v5373_v14 = vpack.c.bf16 %v1013_v36, %v1009_v62  ;;  %v5406_v35 = vpack.c.bf16 %v1014_v26, %v1010_v25 }
 0x1ef   :  { %3705 = vmatprep.subr.bf16.mxu0 %v5167_v30  ;;  %3735 = vmatpush1.bf16.msra.mxu1 %v5173_v32  ;;  %v4504_v20 = vpop.eup %4503  ;;  %v503_v29 = vadd.f32 1.0, %v4502_v10  ;;  %4515 = vrcp.f32 %v502_v21  ;;  %v1008_v10 = vld [vmem:[%s6228_s5 + $0x1c0] sm:$0xff]  ;;  %v1015_v21 = vld [vmem:[%s6228_s5 + $0x1f8] sm:$0xff] }
 0x1f0   :  { %3286 = vmatmul.mubr.msk.f32.gmra.mrb[24].mxu0 %vm581_vm3, %v4496_v41  ;;  %3302 = vmatmul.mubr.msk.f32.gmra.mrb[14].mxu1 %vm581_vm3, %v4496_v41  ;;  %v998_v41 = vld [vmem:[%s6228_s5 + $0x170] sm:$0xff]  ;;  %v4506_v44 = vpop.eup %4505  ;;  %4517 = vpow2.f32 %v3280_v22  ;;  %v444_v22 = vadd.f32 %v5093_v48, %v5074_v19  ;;  %v5400_v19 = vpack.c.bf16 %v1012_v16, %v1008_v10  ;;  %v559_v10 = vld [vmem:[%s6229_s6] sm:$0xf] }
 0x1f1   :  { %712 = vmatprep.mubr.f32.mxu0 %v4825_v12  ;;  %873 = vmatprep.mubr.f32.mxu1 %v4825_v12  ;;  %4519 = vrcp.f32 %v503_v29  ;;  %v5338_v56 = vpack.c.bf16 %v998_v41, %v994_v40 }
 0x1f2   :  { %3707 = vmatpush1.bf16.msra.mxu0 %v5195_v46  ;;  %3737 = vmatprep.subr.bf16.mxu1 %v5204_v51  ;;  %4521 = vpow2.f32 %v3281_v61  ;;  %v3283_v38 = vmul.f32 -1.442695, %v444_v22 }
 0x1f3   :  { %3709 = vmatprep.subr.bf16.mxu0 %v5207_v53  ;;  %3739 = vmatpush1.bf16.msra.mxu1 %v5213_v55 }
 0x1f4   :  { %3287 = vmatmul.mubr.msk.f32.gmra.mrb[26].mxu0 %vm581_vm3, %v4500_v3  ;;  %3303 = vmatmul.mubr.msk.f32.gmra.mrb[16].mxu1 %vm581_vm3, %v4500_v3  ;;  %v504_v3 = vadd.f32 1.0, %v4506_v44 }
 0x1f5   :  { %718 = vmatprep.mubr.f32.mxu0 %v4825_v12  ;;  %879 = vmatprep.mubr.f32.mxu1 %v4825_v12  ;;  %v4508_v54 = vpop.eup %4507 }
 0x1f6   :  { %3711 = vmatpush1.bf16.msra.mxu0 %v5239_v63  ;;  %3741 = vmatprep.subr.bf16.mxu1 %v5248_v2  ;;  %v4510_v60 = vpop.eup %4509  ;;  %4523 = vrcp.f32 %v504_v3 }
 0x1f7   :  { %3713 = vmatprep.subr.bf16.mxu0 %v5251_v5  ;;  %3743 = vmatpush1.bf16.msra.mxu1 %v5257_v7  ;;  %v4512_v1 = vpop.eup %4511  ;;  %v505_v11 = vadd.f32 1.0, %v4510_v60  ;;  %4525 = vpow2.f32 %v3282_v43 }
 0x1f8   :  { %3288 = vmatmul.mubr.msk.f32.gmra.mrb[28].mxu0 %vm581_vm3, %v4504_v20  ;;  %3304 = vmatmul.mubr.msk.f32.gmra.mrb[18].mxu1 %vm581_vm3, %v4504_v20  ;;  %v1011_v20 = vld [vmem:[%s6228_s5 + $0x1d8] sm:$0xff]  ;;  %v4514_v29 = vpop.eup %4513 }
 0x1f9   :  { %724 = vmatprep.mubr.f32.mxu0 %v4825_v12  ;;  %885 = vmatprep.mubr.f32.mxu1 %v4825_v12  ;;  %v5402_v48 = vpack.c.bf16 %v1015_v21, %v1011_v20  ;;  %v4516_v33 = vpop.eup %4515  ;;  %4527 = vrcp.f32 %v505_v11  ;;  %v506_v40 = vadd.f32 1.0, %v4514_v29 }
 0x1fa   :  { %3715 = vmatpush1.bf16.msra.mxu0 %v5279_v23  ;;  %3745 = vmatprep.subr.bf16.mxu1 %v5288_v27  ;;  %v4518_v37 = vpop.eup %4517  ;;  %4529 = vpow2.f32 %v3283_v38 }
 0x1fb   :  { %3717 = vmatprep.subr.bf16.mxu0 %v5291_v31  ;;  %3747 = vmatpush1.bf16.msra.mxu1 %v5297_v34  ;;  %v4520_v39 = vpop.eup %4519  ;;  %v507_v41 = vadd.f32 1.0, %v4518_v37  ;;  %4531 = vrcp.f32 %v506_v40 }
 0x1fc   :  { %3289 = vmatmul.mubr.msk.f32.gmra.mrb[30].mxu0 %vm581_vm3, %v4508_v54  ;;  %3305 = vmatmul.mubr.msk.f32.gmra.mrb[20].mxu1 %vm581_vm3, %v4508_v54  ;;  %v4522_v44 = vpop.eup %4521 }
 0x1fd   :  { %730 = vmatprep.mubr.f32.mxu0 %v4825_v12  ;;  %891 = vmatprep.mubr.f32.mxu1 %v4825_v12  ;;  %4533 = vrcp.f32 %v507_v41  ;;  %v508_v54 = vadd.f32 1.0, %v4522_v44 }
 0x1fe   :  { %3719 = vmatpush1.bf16.msra.mxu0 %v5323_v45  ;;  %3749 = vmatprep.subr.bf16.mxu1 %v5332_v52 }
 0x1ff   :  { %3721 = vmatprep.subr.bf16.mxu0 %v5335_v50  ;;  %3751 = vmatpush1.bf16.msra.mxu1 %v5338_v56  ;;  %4535 = vrcp.f32 %v508_v54 }
 0x200   :  { %3290 = vmatmul.mubr.msk.f32.gmra.mrb[32].mxu0 %vm581_vm3, %v4512_v1  ;;  %3306 = vmatmul.mubr.msk.f32.gmra.mrb[22].mxu1 %vm581_vm3, %v4512_v1  ;;  %v4524_v42 = vpop.eup %4523  ;;  %v561_v1 = vlaneseq }
 0x201   :  { %736 = vmatprep.mubr.f32.mxu0 %v4825_v12  ;;  %897 = vmatprep.mubr.f32.mxu1 %v4825_v12  ;;  %v4526_v47 = vpop.eup %4525 }
 0x202   :  { %3723 = vmatpush1.bf16.msra.mxu0 %v5363_v8  ;;  %3753 = vmatprep.subr.bf16.mxu1 %v5366_v9  ;;  %v509_v57 = vadd.f32 1.0, %v4526_v47  ;;  %v5489_v3 = vshrl.u32 %v561_v1, 7 }
 0x203   :  { %3725 = vmatprep.subr.bf16.mxu0 %v5373_v14  ;;  %3755 = vmatpush1.bf16.msra.mxu1 %v5378_v17  ;;  %v4528_v49 = vpop.eup %4527 }
 0x204   :  { %3291 = vmatmul.mubr.msk.f32.gmra.mrb[34].mxu0 %vm581_vm3, %v4516_v33  ;;  %3307 = vmatmul.mubr.msk.f32.gmra.mrb[24].mxu1 %vm581_vm3, %v4516_v33  ;;  %v4530_v58 = vpop.eup %4529  ;;  %4537 = vrcp.f32 %v509_v57  ;;  %v563_v43 = vsub.s32 0, %v5489_v3  ;;  %v567_v11 = vsub.s32 1, %v5489_v3  ;;  %v575_v25 = vsub.s32 3, %v5489_v3 }
 0x205   :  { %742 = vmatprep.mubr.f32.mxu0 %v4825_v12  ;;  %903 = vmatprep.mubr.f32.mxu1 %v4825_v12  ;;  %v4532_v59 = vpop.eup %4531  ;;  %v510_v61 = vadd.f32 1.0, %v4530_v58 }
 0x206   :  { %3727 = vmatpush1.bf16.msra.mxu0 %v5400_v19  ;;  %3757 = vmatprep.subr.bf16.mxu1 %v5402_v48  ;;  %v5496_v16 = vrot.slane %v559_v10, %v563_v43  ;;  %v5498_v20 = vrot.slane %v559_v10, %v567_v11  ;;  %v5503_v40 = vrot.slane %v559_v10, %v575_v25 }
 0x207   :  { %3759 = vmatpush1.bf16.msra.mxu1 %v5406_v35  ;;  %3761 = vmatprep.subr.bf16.mxu0 %v5059_v15  ;;  %v4534_v60 = vpop.eup %4533  ;;  %4539 = vrcp.f32 %v510_v61 }
 0x208   :  { %3292 = vmatmul.mubr.msk.f32.gmra.mrb[36].mxu0 %vm581_vm3, %v4520_v39  ;;  %3308 = vmatmul.mubr.msk.f32.gmra.mrb[26].mxu1 %vm581_vm3, %v4520_v39 }
 0x209   :  { %748 = vmatprep.mubr.f32.mxu0 %v4825_v12  ;;  %909 = vmatprep.mubr.f32.mxu1 %v4825_v12  ;;  %v4536_v62 = vpop.eup %4535 }
 0x20a   :  { %3793 = vmatprep.subr.bf16.mxu1 %v5068_v18 }
 0x20c   :  { %3293 = vmatmul.mubr.msk.f32.gmra.mrb[38].mxu0 %vm581_vm3, %v4524_v42  ;;  %3309 = vmatmul.mubr.msk.f32.gmra.mrb[28].mxu1 %vm581_vm3, %v4524_v42  ;;  %v571_v42 = vsub.s32 2, %v5489_v3 }
 0x20d   :  { %754 = vmatprep.mubr.f32.mxu0 %v4825_v12  ;;  %915 = vmatprep.mubr.f32.mxu1 %v4825_v12 }
 0x20e   :  { %v4538_v36 = vpop.eup %4537  ;;  %v5509_v61 = vrot.slane %v559_v10, %v571_v42 }
 0x210   :  { %3294 = vmatmul.mubr.msk.f32.gmra.mrb[40].mxu0 %vm581_vm3, %v4528_v49  ;;  %3310 = vmatmul.mubr.msk.f32.gmra.mrb[30].mxu1 %vm581_vm3, %v4528_v49 }
 0x211   :  { %760 = vmatprep.mubr.f32.mxu0 %v4825_v12  ;;  %921 = vmatprep.mubr.f32.mxu1 %v4825_v12  ;;  %v4540_v0 = vpop.eup %4539 }
 0x214   :  { %3295 = vmatmul.mubr.msk.f32.gmra.mrb[42].mxu0 %vm581_vm3, %v4532_v59  ;;  %3311 = vmatmul.mubr.msk.f32.gmra.mrb[32].mxu1 %vm581_vm3, %v4532_v59 }
 0x215   :  { %766 = vmatprep.mubr.f32.mxu0 %v4825_v12  ;;  %927 = vmatprep.mubr.f32.mxu1 %v4825_v12 }
 0x218   :  { %3296 = vmatmul.mubr.msk.f32.gmra.mrb[44].mxu0 %vm581_vm3, %v4534_v60  ;;  %3312 = vmatmul.mubr.msk.f32.gmra.mrb[34].mxu1 %vm581_vm3, %v4534_v60 }
 0x219   :  { %772 = vmatprep.mubr.f32.mxu0 %v4825_v12  ;;  %933 = vmatprep.mubr.f32.mxu1 %v4825_v12 }
 0x21c   :  { %3297 = vmatmul.mubr.msk.f32.gmra.mrb[46].mxu0 %vm581_vm3, %v4536_v62  ;;  %3313 = vmatmul.mubr.msk.f32.gmra.mrb[36].mxu1 %vm581_vm3, %v4536_v62 }
 0x21d   :  { %778 = vmatprep.mubr.f32.mxu0 %v4825_v12  ;;  %939 = vmatprep.mubr.f32.mxu1 %v4825_v12 }
 0x220   :  { %3298 = vmatmul.mubr.msk.f32.gmra.mrb[48].mxu0 %vm581_vm3, %v4538_v36  ;;  %3314 = vmatmul.mubr.msk.f32.gmra.mrb[38].mxu1 %vm581_vm3, %v4538_v36 }
 0x221   :  { %784 = vmatprep.mubr.f32.mxu0 %v4825_v12  ;;  %945 = vmatprep.mubr.f32.mxu1 %v4825_v12 }
 0x224   :  { %3299 = vmatmul.mubr.msk.f32.gmra.mrb[50].mxu0 %vm581_vm3, %v4540_v0  ;;  %3315 = vmatmul.mubr.msk.f32.gmra.mrb[40].mxu1 %vm581_vm3, %v4540_v0 }
 0x225   :  { %1080 = vmatprep.mubr.f32.mxu0 %v4825_v12  ;;  %1157 = vmatprep.mubr.f32.mxu1 %v4825_v12 }
 0x228   :  { %1081 = vmatmul.mubr.f32.vlgmr.msra.gmra.mrb[20].mxu0 %v4825_v12  ;;  %1158 = vmatmul.mubr.f32.vlgmr.msra.gmra.mrb[10].mxu1 %v4825_v12 }
 0x229   :  { %1086 = vmatprep.mubr.f32.mxu0 %v4825_v12  ;;  %1163 = vmatprep.mubr.f32.mxu1 %v4825_v12 }
 0x22a   :  { %3763 = vmatpush1.bf16.msra.mxu0 %v5117_v4  ;;  %3795 = vmatpush1.bf16.msra.mxu1 %v5130_v13 }
 0x22b   :  { %3765 = vmatprep.subr.bf16.mxu0 %v5119_v6  ;;  %3797 = vmatprep.subr.bf16.mxu1 %v5165_v28 }
 0x22c   :  { %1087 = vmatmul.mubr.f32.gmra.mrb[22].mxu0 %v4825_v12  ;;  %1164 = vmatmul.mubr.f32.gmra.mrb[12].mxu1 %v4825_v12 }
 0x22d   :  { %1290 = vmatprep.mubr.f32.mxu0 %v4825_v12  ;;  %1367 = vmatprep.mubr.f32.mxu1 %v4825_v12 }
 0x22e   :  { %3767 = vmatpush1.bf16.msra.mxu0 %v5155_v24  ;;  %3799 = vmatpush1.bf16.msra.mxu1 %v5173_v32 }
 0x22f   :  { %3769 = vmatprep.subr.bf16.mxu0 %v5167_v30  ;;  %3801 = vmatprep.subr.bf16.mxu1 %v5204_v51 }
 0x232   :  { %3771 = vmatpush1.bf16.msra.mxu0 %v5195_v46  ;;  %3803 = vmatpush1.bf16.msra.mxu1 %v5213_v55 }
 0x233   :  { %3773 = vmatprep.subr.bf16.mxu0 %v5207_v53  ;;  %3805 = vmatprep.subr.bf16.mxu1 %v5248_v2 }
 0x236   :  { %3775 = vmatpush1.bf16.msra.mxu0 %v5239_v63  ;;  %3807 = vmatpush1.bf16.msra.mxu1 %v5257_v7 }
 0x237   :  { %3777 = vmatprep.subr.bf16.mxu0 %v5251_v5  ;;  %3809 = vmatprep.subr.bf16.mxu1 %v5288_v27 }
 0x23a   :  { %3779 = vmatpush1.bf16.msra.mxu0 %v5279_v23  ;;  %3811 = vmatpush1.bf16.msra.mxu1 %v5297_v34 }
 0x23b   :  { %3781 = vmatprep.subr.bf16.mxu0 %v5291_v31  ;;  %3813 = vmatprep.subr.bf16.mxu1 %v5332_v52 }
 0x23e   :  { %3783 = vmatpush1.bf16.msra.mxu0 %v5323_v45  ;;  %3815 = vmatpush1.bf16.msra.mxu1 %v5338_v56 }
 0x23f   :  { %3785 = vmatprep.subr.bf16.mxu0 %v5335_v50  ;;  %3817 = vmatprep.subr.bf16.mxu1 %v5366_v9 }
 0x242   :  { %3787 = vmatpush1.bf16.msra.mxu0 %v5363_v8  ;;  %3819 = vmatpush1.bf16.msra.mxu1 %v5378_v17 }
 0x243   :  { %3789 = vmatprep.subr.bf16.mxu0 %v5373_v14  ;;  %3821 = vmatprep.subr.bf16.mxu1 %v5402_v48 }
 0x246   :  { %3791 = vmatpush1.bf16.msra.mxu0 %v5400_v19  ;;  %3823 = vmatpush1.bf16.msra.mxu1 %v5406_v35 }
 0x247   :  { %3825 = vmatprep.subr.bf16.mxu0 %v5059_v15  ;;  %3857 = vmatprep.subr.bf16.mxu1 %v5068_v18 }
 0x2fb   :  { %v1082_v21 = vpop.f32.mrb[20].mxu0  ;;  %v1159_v22 = vpop.f32.mrb[10].mxu1 }
 0x2fc   :  { %v4342_v26 = vadd.f32 %v1082_v21, %v5496_v16  ;;  %v1084_v29 = vpop.f32.mrb[21].mxu0  ;;  %v1161_v33 = vpop.f32.mrb[11].mxu1  ;;  %v4374_v0 = vadd.f32 %v1159_v22, %v5509_v61 }
 0x2fd   :  { %v4343_v37 = vadd.f32 %v1084_v29, %v5498_v20  ;;  %v4375_v59 = vadd.f32 %v1161_v33, %v5503_v40 }
 0x2fe   :  { %v3316_v38 = vmul.f32 -1.442695, %v4342_v26 }
 0x2ff   :  { %v3318_v39 = vmul.f32 -1.442695, %v4343_v37  ;;  %v1088_v41 = vpop.f32.mrb[22].mxu0  ;;  %v1165_v44 = vpop.f32.mrb[12].mxu1  ;;  %v3320_v62 = vmul.f32 -1.442695, %v4375_v59 }
 0x300   :  { %4541 = vpow2.f32 %v3316_v38  ;;  %v4344_v47 = vadd.f32 %v1088_v41, %v5496_v16  ;;  %v1090_v49 = vpop.f32.mrb[23].mxu0  ;;  %v1167_v54 = vpop.f32.mrb[13].mxu1  ;;  %v4376_v26 = vadd.f32 %v1165_v44, %v5509_v61 }
 0x301   :  { %4543 = vpow2.f32 %v3318_v39  ;;  %v4345_v57 = vadd.f32 %v1090_v49, %v5498_v20  ;;  %v4377_v36 = vadd.f32 %v1167_v54, %v5503_v40 }
 0x302   :  { %v3317_v58 = vmul.f32 -1.442695, %v4344_v47 }
 0x303   :  { %v3319_v60 = vmul.f32 -1.442695, %v4345_v57  ;;  %v3321_v21 = vmul.f32 -1.442695, %v4377_v36 }
 0x304   :  { %4545 = vpow2.f32 %v3317_v58 }
 0x305   :  { %4547 = vpow2.f32 %v3319_v60 }
 0x306   :  { %4549 = vpow2.f32 %v3320_v62 }
 0x307   :  { %4551 = vtanh.f32 %v4374_v0 }
 0x30a   :  { %v4542_v1 = vpop.eup %4541 }
 0x30b   :  { %v4544_v43 = vpop.eup %4543  ;;  %v1184_v11 = vadd.f32 1.0, %v4542_v1 }
 0x30c   :  { %v1196_v25 = vadd.f32 1.0, %v4544_v43 }
 0x30d   :  { %4553 = vrcp.f32 %v1184_v11 }
 0x30e   :  { %v4546_v29 = vpop.eup %4545  ;;  %4555 = vrcp.f32 %v1196_v25 }
 0x30f   :  { %v4548_v10 = vpop.eup %4547  ;;  %v1185_v33 = vadd.f32 1.0, %v4546_v29  ;;  %4557 = vpow2.f32 %v3321_v21 }
 0x310   :  { %4559 = vtanh.f32 %v4376_v26  ;;  %v1197_v37 = vadd.f32 1.0, %v4548_v10  ;;  %v4550_v22 = vpop.eup %4549 }
 0x311   :  { %4561 = vrcp.f32 %v1185_v33  ;;  %v4552_v38 = vpop.eup %4551  ;;  %v1210_v47 = vadd.f32 1.0, %v4550_v22 }
 0x312   :  { %4563 = vrcp.f32 %v1197_v37 }
 0x313   :  { %4565 = vrcp.f32 %v1210_v47 }
 0x317   :  { %v4554_v39 = vpop.eup %4553 }
 0x318   :  { %v4556_v41 = vpop.eup %4555  ;;  %v1218_v42 = vmul.f32 %v4554_v39, %v4552_v38 }
 0x319   :  { %v4558_v49 = vpop.eup %4557  ;;  %v1216_v54 = vmul.f32 0.0, %v4556_v41 }
 0x31a   :  { %v4560_v57 = vpop.eup %4559  ;;  %v1211_v62 = vadd.f32 1.0, %v4558_v49 }
 0x31b   :  { %v4562_v44 = vpop.eup %4561  ;;  %v5514_v58 = vadd.f32 %v1218_v42, %v1216_v54 }
 0x31c   :  { %v4564_v59 = vpop.eup %4563  ;;  %v1219_v60 = vmul.f32 %v4562_v44, %v4560_v57 }
 0x31d   :  { %4567 = vtanh.f32 %v5514_v58  ;;  %v1217_v36 = vmul.f32 0.0, %v4564_v59  ;;  %v4566_v1 = vpop.eup %4565 }
 0x31e   :  { %4569 = vrcp.f32 %v1211_v62 }
 0x31f   :  { %v5517_v0 = vadd.f32 %v1219_v60, %v1217_v36 }
 0x321   :  { %4571 = vtanh.f32 %v5517_v0 }
 0x327   :  { %v4568_v43 = vpop.eup %4567 }
 0x328   :  { %v1224_v11 = vmul.f32 %v4568_v43, %v4566_v1  ;;  %v4570_v21 = vpop.eup %4569 }
 0x32a   :  { %1291 = vmatmul.mubr.f32.vlgmr.msra.gmra.mrb[24].mxu0 %v1224_v11  ;;  %1368 = vmatmul.mubr.f32.vlgmr.msra.gmra.mrb[14].mxu1 %v1224_v11 }
 0x32b   :  { %v4572_v25 = vpop.eup %4571  ;;  %1296 = vmatprep.mubr.f32.mxu0 %v4825_v12  ;;  %1373 = vmatprep.mubr.f32.mxu1 %v4825_v12 }
 0x32c   :  { %v1225_v26 = vmul.f32 %v4572_v25, %v4570_v21  ;;  %3827 = vmatpush1.bf16.msra.mxu0 %v5117_v4  ;;  %3859 = vmatpush1.bf16.msra.mxu1 %v5130_v13 }
 0x32d   :  { %3829 = vmatprep.subr.bf16.mxu0 %v5119_v6  ;;  %3861 = vmatprep.subr.bf16.mxu1 %v5165_v28 }
 0x32e   :  { %1297 = vmatmul.mubr.f32.gmra.mrb[26].mxu0 %v1225_v26  ;;  %1374 = vmatmul.mubr.f32.gmra.mrb[16].mxu1 %v1225_v26 }
 0x32f   :  { %1500 = vmatprep.mubr.f32.mxu0 %v4825_v12  ;;  %1577 = vmatprep.mubr.f32.mxu1 %v4825_v12 }
 0x330   :  { %3831 = vmatpush1.bf16.msra.mxu0 %v5155_v24  ;;  %3863 = vmatpush1.bf16.msra.mxu1 %v5173_v32 }
 0x331   :  { %3833 = vmatprep.subr.bf16.mxu0 %v5167_v30  ;;  %3865 = vmatprep.subr.bf16.mxu1 %v5204_v51 }
 0x334   :  { %3835 = vmatpush1.bf16.msra.mxu0 %v5195_v46  ;;  %3867 = vmatpush1.bf16.msra.mxu1 %v5213_v55 }
 0x335   :  { %3837 = vmatprep.subr.bf16.mxu0 %v5207_v53  ;;  %3869 = vmatprep.subr.bf16.mxu1 %v5248_v2 }
 0x338   :  { %3839 = vmatpush1.bf16.msra.mxu0 %v5239_v63  ;;  %3871 = vmatpush1.bf16.msra.mxu1 %v5257_v7 }
 0x339   :  { %3841 = vmatprep.subr.bf16.mxu0 %v5251_v5  ;;  %3873 = vmatprep.subr.bf16.mxu1 %v5288_v27 }
 0x33c   :  { %3843 = vmatpush1.bf16.msra.mxu0 %v5279_v23  ;;  %3875 = vmatpush1.bf16.msra.mxu1 %v5297_v34 }
 0x33d   :  { %3845 = vmatprep.subr.bf16.mxu0 %v5291_v31  ;;  %3877 = vmatprep.subr.bf16.mxu1 %v5332_v52 }
 0x340   :  { %3847 = vmatpush1.bf16.msra.mxu0 %v5323_v45  ;;  %3879 = vmatpush1.bf16.msra.mxu1 %v5338_v56 }
 0x341   :  { %3849 = vmatprep.subr.bf16.mxu0 %v5335_v50  ;;  %3881 = vmatprep.subr.bf16.mxu1 %v5366_v9 }
 0x344   :  { %3851 = vmatpush1.bf16.msra.mxu0 %v5363_v8  ;;  %3883 = vmatpush1.bf16.msra.mxu1 %v5378_v17 }
 0x345   :  { %3853 = vmatprep.subr.bf16.mxu0 %v5373_v14  ;;  %3885 = vmatprep.subr.bf16.mxu1 %v5402_v48 }
 0x348   :  { %3855 = vmatpush1.bf16.msra.mxu0 %v5400_v19  ;;  %3887 = vmatpush1.bf16.msra.mxu1 %v5406_v35 }
 0x349   :  { %3889 = vmatprep.subr.bf16.mxu0 %v5059_v15  ;;  %3921 = vmatprep.subr.bf16.mxu1 %v5068_v18 }
 0x3fd   :  { %v1292_v29 = vpop.f32.mrb[24].mxu0  ;;  %v1369_v10 = vpop.f32.mrb[14].mxu1 }
 0x3fe   :  { %v4346_v33 = vadd.f32 %v1292_v29, %v5496_v16  ;;  %v1294_v37 = vpop.f32.mrb[25].mxu0  ;;  %v1371_v22 = vpop.f32.mrb[15].mxu1  ;;  %v4378_v43 = vadd.f32 %v1369_v10, %v5509_v61 }
 0x3ff   :  { %v4347_v38 = vadd.f32 %v1294_v37, %v5498_v20  ;;  %v4379_v60 = vadd.f32 %v1371_v22, %v5503_v40 }
 0x400   :  { %v3322_v39 = vmul.f32 -1.442695, %v4346_v33 }
 0x401   :  { %v3324_v41 = vmul.f32 -1.442695, %v4347_v38  ;;  %v1298_v42 = vpop.f32.mrb[26].mxu0  ;;  %v1375_v47 = vpop.f32.mrb[16].mxu1  ;;  %v3326_v36 = vmul.f32 -1.442695, %v4379_v60 }
 0x402   :  { %4573 = vpow2.f32 %v3322_v39  ;;  %v4348_v49 = vadd.f32 %v1298_v42, %v5496_v16  ;;  %v1300_v54 = vpop.f32.mrb[27].mxu0  ;;  %v1377_v57 = vpop.f32.mrb[17].mxu1  ;;  %v4380_v33 = vadd.f32 %v1375_v47, %v5509_v61 }
 0x403   :  { %4575 = vpow2.f32 %v3324_v41  ;;  %v4349_v44 = vadd.f32 %v1300_v54, %v5498_v20  ;;  %v4381_v1 = vadd.f32 %v1377_v57, %v5503_v40 }
 0x404   :  { %v3323_v59 = vmul.f32 -1.442695, %v4348_v49 }
 0x405   :  { %v3325_v62 = vmul.f32 -1.442695, %v4349_v44  ;;  %v3327_v26 = vmul.f32 -1.442695, %v4381_v1 }
 0x406   :  { %4577 = vpow2.f32 %v3323_v59 }
 0x407   :  { %4579 = vpow2.f32 %v3325_v62 }
 0x408   :  { %4581 = vpow2.f32 %v3326_v36 }
 0x409   :  { %4583 = vtanh.f32 %v4378_v43 }
 0x40c   :  { %v4574_v11 = vpop.eup %4573 }
 0x40d   :  { %v4576_v21 = vpop.eup %4575  ;;  %v1394_v25 = vadd.f32 1.0, %v4574_v11 }
 0x40e   :  { %v1406_v29 = vadd.f32 1.0, %v4576_v21 }
 0x40f   :  { %4585 = vrcp.f32 %v1394_v25 }
 0x410   :  { %v4578_v37 = vpop.eup %4577  ;;  %4587 = vrcp.f32 %v1406_v29 }
 0x411   :  { %v4580_v22 = vpop.eup %4579  ;;  %v1395_v38 = vadd.f32 1.0, %v4578_v37  ;;  %4589 = vpow2.f32 %v3327_v26 }
 0x412   :  { %4591 = vtanh.f32 %v4380_v33  ;;  %v1407_v39 = vadd.f32 1.0, %v4580_v22  ;;  %v4582_v10 = vpop.eup %4581 }
 0x413   :  { %4593 = vrcp.f32 %v1395_v38  ;;  %v4584_v41 = vpop.eup %4583  ;;  %v1420_v57 = vadd.f32 1.0, %v4582_v10 }
 0x414   :  { %4595 = vrcp.f32 %v1407_v39 }
 0x415   :  { %4597 = vrcp.f32 %v1420_v57 }
 0x419   :  { %v4586_v42 = vpop.eup %4585 }
 0x41a   :  { %v4588_v49 = vpop.eup %4587  ;;  %v1428_v54 = vmul.f32 %v4586_v42, %v4584_v41 }
 0x41b   :  { %v4590_v44 = vpop.eup %4589  ;;  %v1426_v59 = vmul.f32 %v4588_v49, %v5514_v58 }
 0x41c   :  { %v4592_v47 = vpop.eup %4591  ;;  %v1421_v43 = vadd.f32 1.0, %v4590_v44 }
 0x41d   :  { %v4594_v60 = vpop.eup %4593  ;;  %v5565_v62 = vadd.f32 %v1428_v54, %v1426_v59 }
 0x41e   :  { %v4596_v36 = vpop.eup %4595  ;;  %v1429_v1 = vmul.f32 %v4594_v60, %v4592_v47 }
 0x41f   :  { %4599 = vtanh.f32 %v5565_v62  ;;  %v1427_v11 = vmul.f32 %v4596_v36, %v5517_v0  ;;  %v4598_v25 = vpop.eup %4597 }
 0x420   :  { %4601 = vrcp.f32 %v1421_v43 }
 0x421   :  { %v5569_v21 = vadd.f32 %v1429_v1, %v1427_v11 }
 0x423   :  { %4603 = vtanh.f32 %v5569_v21 }
 0x429   :  { %v4600_v26 = vpop.eup %4599 }
 0x42a   :  { %v1434_v58 = vmul.f32 %v4600_v26, %v4598_v25  ;;  %v4602_v29 = vpop.eup %4601 }
 0x42c   :  { %1501 = vmatmul.mubr.f32.vlgmr.msra.gmra.mrb[28].mxu0 %v1434_v58  ;;  %1578 = vmatmul.mubr.f32.vlgmr.msra.gmra.mrb[18].mxu1 %v1434_v58 }
 0x42d   :  { %v4604_v33 = vpop.eup %4603  ;;  %1506 = vmatprep.mubr.f32.mxu0 %v4825_v12  ;;  %1583 = vmatprep.mubr.f32.mxu1 %v4825_v12 }
 0x42e   :  { %v1435_v37 = vmul.f32 %v4604_v33, %v4602_v29  ;;  %3891 = vmatpush1.bf16.msra.mxu0 %v5117_v4  ;;  %3923 = vmatpush1.bf16.msra.mxu1 %v5130_v13 }
 0x42f   :  { %3893 = vmatprep.subr.bf16.mxu0 %v5119_v6  ;;  %3925 = vmatprep.subr.bf16.mxu1 %v5165_v28 }
 0x430   :  { %1507 = vmatmul.mubr.f32.gmra.mrb[30].mxu0 %v1435_v37  ;;  %1584 = vmatmul.mubr.f32.gmra.mrb[20].mxu1 %v1435_v37 }
 0x431   :  { %1710 = vmatprep.mubr.f32.mxu0 %v4825_v12  ;;  %1787 = vmatprep.mubr.f32.mxu1 %v4825_v12 }
 0x432   :  { %3895 = vmatpush1.bf16.msra.mxu0 %v5155_v24  ;;  %3927 = vmatpush1.bf16.msra.mxu1 %v5173_v32 }
 0x433   :  { %3897 = vmatprep.subr.bf16.mxu0 %v5167_v30  ;;  %3929 = vmatprep.subr.bf16.mxu1 %v5204_v51 }
 0x436   :  { %3899 = vmatpush1.bf16.msra.mxu0 %v5195_v46  ;;  %3931 = vmatpush1.bf16.msra.mxu1 %v5213_v55 }
 0x437   :  { %3901 = vmatprep.subr.bf16.mxu0 %v5207_v53  ;;  %3933 = vmatprep.subr.bf16.mxu1 %v5248_v2 }
 0x43a   :  { %3903 = vmatpush1.bf16.msra.mxu0 %v5239_v63  ;;  %3935 = vmatpush1.bf16.msra.mxu1 %v5257_v7 }
 0x43b   :  { %3905 = vmatprep.subr.bf16.mxu0 %v5251_v5  ;;  %3937 = vmatprep.subr.bf16.mxu1 %v5288_v27 }
 0x43e   :  { %3907 = vmatpush1.bf16.msra.mxu0 %v5279_v23  ;;  %3939 = vmatpush1.bf16.msra.mxu1 %v5297_v34 }
 0x43f   :  { %3909 = vmatprep.subr.bf16.mxu0 %v5291_v31  ;;  %3941 = vmatprep.subr.bf16.mxu1 %v5332_v52 }
 0x442   :  { %3911 = vmatpush1.bf16.msra.mxu0 %v5323_v45  ;;  %3943 = vmatpush1.bf16.msra.mxu1 %v5338_v56 }
 0x443   :  { %3913 = vmatprep.subr.bf16.mxu0 %v5335_v50  ;;  %3945 = vmatprep.subr.bf16.mxu1 %v5366_v9 }
 0x446   :  { %3915 = vmatpush1.bf16.msra.mxu0 %v5363_v8  ;;  %3947 = vmatpush1.bf16.msra.mxu1 %v5378_v17 }
 0x447   :  { %3917 = vmatprep.subr.bf16.mxu0 %v5373_v14  ;;  %3949 = vmatprep.subr.bf16.mxu1 %v5402_v48 }
 0x44a   :  { %3919 = vmatpush1.bf16.msra.mxu0 %v5400_v19  ;;  %3951 = vmatpush1.bf16.msra.mxu1 %v5406_v35 }
 0x44b   :  { %3953 = vmatprep.subr.bf16.mxu0 %v5059_v15  ;;  %3985 = vmatprep.subr.bf16.mxu1 %v5068_v18 }
 0x4ff   :  { %v1502_v0 = vpop.f32.mrb[28].mxu0  ;;  %v1579_v22 = vpop.f32.mrb[18].mxu1 }
 0x500   :  { %v4350_v38 = vadd.f32 %v1502_v0, %v5496_v16  ;;  %v1504_v39 = vpop.f32.mrb[29].mxu0  ;;  %v1581_v10 = vpop.f32.mrb[19].mxu1  ;;  %v4382_v26 = vadd.f32 %v1579_v22, %v5509_v61 }
 0x501   :  { %v4351_v41 = vadd.f32 %v1504_v39, %v5498_v20  ;;  %v4383_v1 = vadd.f32 %v1581_v10, %v5503_v40 }
 0x502   :  { %v3328_v42 = vmul.f32 -1.442695, %v4350_v38 }
 0x503   :  { %v3330_v49 = vmul.f32 -1.442695, %v4351_v41  ;;  %v1508_v54 = vpop.f32.mrb[30].mxu0  ;;  %v1585_v57 = vpop.f32.mrb[20].mxu1  ;;  %v3332_v11 = vmul.f32 -1.442695, %v4383_v1 }
 0x504   :  { %4605 = vpow2.f32 %v3328_v42  ;;  %v4352_v44 = vadd.f32 %v1508_v54, %v5496_v16  ;;  %v1510_v59 = vpop.f32.mrb[31].mxu0  ;;  %v1587_v47 = vpop.f32.mrb[21].mxu1  ;;  %v4384_v38 = vadd.f32 %v1585_v57, %v5509_v61 }
 0x505   :  { %4607 = vpow2.f32 %v3330_v49  ;;  %v4353_v60 = vadd.f32 %v1510_v59, %v5498_v20  ;;  %v4385_v25 = vadd.f32 %v1587_v47, %v5503_v40 }
 0x506   :  { %v3329_v36 = vmul.f32 -1.442695, %v4352_v44 }
 0x507   :  { %v3331_v43 = vmul.f32 -1.442695, %v4353_v60  ;;  %v3333_v37 = vmul.f32 -1.442695, %v4385_v25 }
 0x508   :  { %4609 = vpow2.f32 %v3329_v36 }
 0x509   :  { %4611 = vpow2.f32 %v3331_v43 }
 0x50a   :  { %4613 = vpow2.f32 %v3332_v11 }
 0x50b   :  { %4615 = vtanh.f32 %v4382_v26 }
 0x50e   :  { %v4606_v58 = vpop.eup %4605 }
 0x50f   :  { %v4608_v29 = vpop.eup %4607  ;;  %v1604_v33 = vadd.f32 1.0, %v4606_v58 }
 0x510   :  { %v1616_v0 = vadd.f32 1.0, %v4608_v29 }
 0x511   :  { %4617 = vrcp.f32 %v1604_v33 }
 0x512   :  { %v4610_v39 = vpop.eup %4609  ;;  %4619 = vrcp.f32 %v1616_v0 }
 0x513   :  { %v4612_v10 = vpop.eup %4611  ;;  %v1605_v41 = vadd.f32 1.0, %v4610_v39  ;;  %4621 = vpow2.f32 %v3333_v37 }
 0x514   :  { %4623 = vtanh.f32 %v4384_v38  ;;  %v1617_v42 = vadd.f32 1.0, %v4612_v10  ;;  %v4614_v22 = vpop.eup %4613 }
 0x515   :  { %4625 = vrcp.f32 %v1605_v41  ;;  %v4616_v49 = vpop.eup %4615  ;;  %v1630_v47 = vadd.f32 1.0, %v4614_v22 }
 0x516   :  { %4627 = vrcp.f32 %v1617_v42 }
 0x517   :  { %4629 = vrcp.f32 %v1630_v47 }
 0x51b   :  { %v4618_v54 = vpop.eup %4617 }
 0x51c   :  { %v4620_v44 = vpop.eup %4619  ;;  %v1638_v59 = vmul.f32 %v4618_v54, %v4616_v49 }
 0x51d   :  { %v4622_v60 = vpop.eup %4621  ;;  %v1636_v36 = vmul.f32 %v4620_v44, %v5565_v62 }
 0x51e   :  { %v4624_v57 = vpop.eup %4623  ;;  %v1631_v26 = vadd.f32 1.0, %v4622_v60 }
 0x51f   :  { %v4626_v1 = vpop.eup %4625  ;;  %v5617_v43 = vadd.f32 %v1638_v59, %v1636_v36 }
 0x520   :  { %v4628_v11 = vpop.eup %4627  ;;  %v1639_v25 = vmul.f32 %v4626_v1, %v4624_v57 }
 0x521   :  { %4631 = vtanh.f32 %v5617_v43  ;;  %v1637_v58 = vmul.f32 %v4628_v11, %v5569_v21  ;;  %v4630_v33 = vpop.eup %4629 }
 0x522   :  { %4633 = vrcp.f32 %v1631_v26 }
 0x523   :  { %v5621_v29 = vadd.f32 %v1639_v25, %v1637_v58 }
 0x525   :  { %4635 = vtanh.f32 %v5621_v29 }
 0x52b   :  { %v4632_v37 = vpop.eup %4631 }
 0x52c   :  { %v1644_v62 = vmul.f32 %v4632_v37, %v4630_v33  ;;  %v4634_v0 = vpop.eup %4633 }
 0x52e   :  { %1711 = vmatmul.mubr.f32.vlgmr.msra.gmra.mrb[32].mxu0 %v1644_v62  ;;  %1788 = vmatmul.mubr.f32.vlgmr.msra.gmra.mrb[22].mxu1 %v1644_v62 }
 0x52f   :  { %v4636_v38 = vpop.eup %4635  ;;  %1716 = vmatprep.mubr.f32.mxu0 %v4825_v12  ;;  %1793 = vmatprep.mubr.f32.mxu1 %v4825_v12 }
 0x530   :  { %v1645_v39 = vmul.f32 %v4636_v38, %v4634_v0  ;;  %3955 = vmatpush1.bf16.msra.mxu0 %v5117_v4  ;;  %3987 = vmatpush1.bf16.msra.mxu1 %v5130_v13 }
 0x531   :  { %3957 = vmatprep.subr.bf16.mxu0 %v5119_v6  ;;  %3989 = vmatprep.subr.bf16.mxu1 %v5165_v28 }
 0x532   :  { %1717 = vmatmul.mubr.f32.gmra.mrb[34].mxu0 %v1645_v39  ;;  %1794 = vmatmul.mubr.f32.gmra.mrb[24].mxu1 %v1645_v39 }
 0x533   :  { %1920 = vmatprep.mubr.f32.mxu0 %v4825_v12  ;;  %1997 = vmatprep.mubr.f32.mxu1 %v4825_v12 }
 0x534   :  { %3959 = vmatpush1.bf16.msra.mxu0 %v5155_v24  ;;  %3991 = vmatpush1.bf16.msra.mxu1 %v5173_v32 }
 0x535   :  { %3961 = vmatprep.subr.bf16.mxu0 %v5167_v30  ;;  %3993 = vmatprep.subr.bf16.mxu1 %v5204_v51 }
 0x538   :  { %3963 = vmatpush1.bf16.msra.mxu0 %v5195_v46  ;;  %3995 = vmatpush1.bf16.msra.mxu1 %v5213_v55 }
 0x539   :  { %3965 = vmatprep.subr.bf16.mxu0 %v5207_v53  ;;  %3997 = vmatprep.subr.bf16.mxu1 %v5248_v2 }
 0x53c   :  { %3967 = vmatpush1.bf16.msra.mxu0 %v5239_v63  ;;  %3999 = vmatpush1.bf16.msra.mxu1 %v5257_v7 }
 0x53d   :  { %3969 = vmatprep.subr.bf16.mxu0 %v5251_v5  ;;  %4001 = vmatprep.subr.bf16.mxu1 %v5288_v27 }
 0x540   :  { %3971 = vmatpush1.bf16.msra.mxu0 %v5279_v23  ;;  %4003 = vmatpush1.bf16.msra.mxu1 %v5297_v34 }
 0x541   :  { %3973 = vmatprep.subr.bf16.mxu0 %v5291_v31  ;;  %4005 = vmatprep.subr.bf16.mxu1 %v5332_v52 }
 0x544   :  { %3975 = vmatpush1.bf16.msra.mxu0 %v5323_v45  ;;  %4007 = vmatpush1.bf16.msra.mxu1 %v5338_v56 }
 0x545   :  { %3977 = vmatprep.subr.bf16.mxu0 %v5335_v50  ;;  %4009 = vmatprep.subr.bf16.mxu1 %v5366_v9 }
 0x548   :  { %3979 = vmatpush1.bf16.msra.mxu0 %v5363_v8  ;;  %4011 = vmatpush1.bf16.msra.mxu1 %v5378_v17 }
 0x549   :  { %3981 = vmatprep.subr.bf16.mxu0 %v5373_v14  ;;  %4013 = vmatprep.subr.bf16.mxu1 %v5402_v48 }
 0x54c   :  { %3983 = vmatpush1.bf16.msra.mxu0 %v5400_v19  ;;  %4015 = vmatpush1.bf16.msra.mxu1 %v5406_v35 }
 0x54d   :  { %4017 = vmatprep.subr.bf16.mxu0 %v5059_v15  ;;  %4049 = vmatprep.subr.bf16.mxu1 %v5068_v18 }
 0x601   :  { %v1712_v21 = vpop.f32.mrb[32].mxu0  ;;  %v1789_v10 = vpop.f32.mrb[22].mxu1 }
 0x602   :  { %v4354_v41 = vadd.f32 %v1712_v21, %v5496_v16  ;;  %v1714_v42 = vpop.f32.mrb[33].mxu0  ;;  %v1791_v22 = vpop.f32.mrb[23].mxu1  ;;  %v4386_v37 = vadd.f32 %v1789_v10, %v5509_v61 }
 0x603   :  { %v4355_v49 = vadd.f32 %v1714_v42, %v5498_v20  ;;  %v4387_v25 = vadd.f32 %v1791_v22, %v5503_v40 }
 0x604   :  { %v3334_v54 = vmul.f32 -1.442695, %v4354_v41 }
 0x605   :  { %v3336_v44 = vmul.f32 -1.442695, %v4355_v49  ;;  %v1718_v59 = vpop.f32.mrb[34].mxu0  ;;  %v1795_v47 = vpop.f32.mrb[24].mxu1  ;;  %v3338_v58 = vmul.f32 -1.442695, %v4387_v25 }
 0x606   :  { %4637 = vpow2.f32 %v3334_v54  ;;  %v4356_v60 = vadd.f32 %v1718_v59, %v5496_v16  ;;  %v1720_v36 = vpop.f32.mrb[35].mxu0  ;;  %v1797_v57 = vpop.f32.mrb[25].mxu1  ;;  %v4388_v41 = vadd.f32 %v1795_v47, %v5509_v61 }
 0x607   :  { %4639 = vpow2.f32 %v3336_v44  ;;  %v4357_v1 = vadd.f32 %v1720_v36, %v5498_v20  ;;  %v4389_v33 = vadd.f32 %v1797_v57, %v5503_v40 }
 0x608   :  { %v3335_v11 = vmul.f32 -1.442695, %v4356_v60 }
 0x609   :  { %v3337_v26 = vmul.f32 -1.442695, %v4357_v1  ;;  %v3339_v39 = vmul.f32 -1.442695, %v4389_v33 }
 0x60a   :  { %4641 = vpow2.f32 %v3335_v11 }
 0x60b   :  { %4643 = vpow2.f32 %v3337_v26 }
 0x60c   :  { %4645 = vpow2.f32 %v3338_v58 }
 0x60d   :  { %4647 = vtanh.f32 %v4386_v37 }
 0x610   :  { %v4638_v62 = vpop.eup %4637 }
 0x611   :  { %v4640_v0 = vpop.eup %4639  ;;  %v1814_v38 = vadd.f32 1.0, %v4638_v62 }
 0x612   :  { %v1826_v21 = vadd.f32 1.0, %v4640_v0 }
 0x613   :  { %4649 = vrcp.f32 %v1814_v38 }
 0x614   :  { %v4642_v42 = vpop.eup %4641  ;;  %4651 = vrcp.f32 %v1826_v21 }
 0x615   :  { %v4644_v22 = vpop.eup %4643  ;;  %v1815_v49 = vadd.f32 1.0, %v4642_v42  ;;  %4653 = vpow2.f32 %v3339_v39 }
 0x616   :  { %4655 = vtanh.f32 %v4388_v41  ;;  %v1827_v54 = vadd.f32 1.0, %v4644_v22  ;;  %v4646_v10 = vpop.eup %4645 }
 0x617   :  { %4657 = vrcp.f32 %v1815_v49  ;;  %v4648_v44 = vpop.eup %4647  ;;  %v1840_v57 = vadd.f32 1.0, %v4646_v10 }
 0x618   :  { %4659 = vrcp.f32 %v1827_v54 }
 0x619   :  { %4661 = vrcp.f32 %v1840_v57 }
 0x61d   :  { %v4650_v59 = vpop.eup %4649 }
 0x61e   :  { %v4652_v60 = vpop.eup %4651  ;;  %v1848_v36 = vmul.f32 %v4650_v59, %v4648_v44 }
 0x61f   :  { %v4654_v1 = vpop.eup %4653  ;;  %v1846_v11 = vmul.f32 %v4652_v60, %v5617_v43 }
 0x620   :  { %v4656_v47 = vpop.eup %4655  ;;  %v1841_v37 = vadd.f32 1.0, %v4654_v1 }
 0x621   :  { %v4658_v25 = vpop.eup %4657  ;;  %v5669_v26 = vadd.f32 %v1848_v36, %v1846_v11 }
 0x622   :  { %v4660_v58 = vpop.eup %4659  ;;  %v1849_v33 = vmul.f32 %v4658_v25, %v4656_v47 }
 0x623   :  { %4663 = vtanh.f32 %v5669_v26  ;;  %v1847_v62 = vmul.f32 %v4660_v58, %v5621_v29  ;;  %v4662_v38 = vpop.eup %4661 }
 0x624   :  { %4665 = vrcp.f32 %v1841_v37 }
 0x625   :  { %v5673_v0 = vadd.f32 %v1849_v33, %v1847_v62 }
 0x627   :  { %4667 = vtanh.f32 %v5673_v0 }
 0x62d   :  { %v4664_v39 = vpop.eup %4663 }
 0x62e   :  { %v1854_v43 = vmul.f32 %v4664_v39, %v4662_v38  ;;  %v4666_v21 = vpop.eup %4665 }
 0x630   :  { %1921 = vmatmul.mubr.f32.vlgmr.msra.gmra.mrb[36].mxu0 %v1854_v43  ;;  %1998 = vmatmul.mubr.f32.vlgmr.msra.gmra.mrb[26].mxu1 %v1854_v43 }
 0x631   :  { %v4668_v41 = vpop.eup %4667  ;;  %1926 = vmatprep.mubr.f32.mxu0 %v4825_v12  ;;  %2003 = vmatprep.mubr.f32.mxu1 %v4825_v12 }
 0x632   :  { %v1855_v42 = vmul.f32 %v4668_v41, %v4666_v21  ;;  %4019 = vmatpush1.bf16.msra.mxu0 %v5117_v4  ;;  %4051 = vmatpush1.bf16.msra.mxu1 %v5130_v13 }
 0x633   :  { %4021 = vmatprep.subr.bf16.mxu0 %v5119_v6  ;;  %4053 = vmatprep.subr.bf16.mxu1 %v5165_v28 }
 0x634   :  { %1927 = vmatmul.mubr.f32.gmra.mrb[38].mxu0 %v1855_v42  ;;  %2004 = vmatmul.mubr.f32.gmra.mrb[28].mxu1 %v1855_v42 }
 0x635   :  { %2130 = vmatprep.mubr.f32.mxu0 %v4825_v12  ;;  %2207 = vmatprep.mubr.f32.mxu1 %v4825_v12 }
 0x636   :  { %4023 = vmatpush1.bf16.msra.mxu0 %v5155_v24  ;;  %4055 = vmatpush1.bf16.msra.mxu1 %v5173_v32 }
 0x637   :  { %4025 = vmatprep.subr.bf16.mxu0 %v5167_v30  ;;  %4057 = vmatprep.subr.bf16.mxu1 %v5204_v51 }
 0x63a   :  { %4027 = vmatpush1.bf16.msra.mxu0 %v5195_v46  ;;  %4059 = vmatpush1.bf16.msra.mxu1 %v5213_v55 }
 0x63b   :  { %4029 = vmatprep.subr.bf16.mxu0 %v5207_v53  ;;  %4061 = vmatprep.subr.bf16.mxu1 %v5248_v2 }
 0x63e   :  { %4031 = vmatpush1.bf16.msra.mxu0 %v5239_v63  ;;  %4063 = vmatpush1.bf16.msra.mxu1 %v5257_v7 }
 0x63f   :  { %4033 = vmatprep.subr.bf16.mxu0 %v5251_v5  ;;  %4065 = vmatprep.subr.bf16.mxu1 %v5288_v27 }
 0x642   :  { %4035 = vmatpush1.bf16.msra.mxu0 %v5279_v23  ;;  %4067 = vmatpush1.bf16.msra.mxu1 %v5297_v34 }
 0x643   :  { %4037 = vmatprep.subr.bf16.mxu0 %v5291_v31  ;;  %4069 = vmatprep.subr.bf16.mxu1 %v5332_v52 }
 0x646   :  { %4039 = vmatpush1.bf16.msra.mxu0 %v5323_v45  ;;  %4071 = vmatpush1.bf16.msra.mxu1 %v5338_v56 }
 0x647   :  { %4041 = vmatprep.subr.bf16.mxu0 %v5335_v50  ;;  %4073 = vmatprep.subr.bf16.mxu1 %v5366_v9 }
 0x64a   :  { %4043 = vmatpush1.bf16.msra.mxu0 %v5363_v8  ;;  %4075 = vmatpush1.bf16.msra.mxu1 %v5378_v17 }
 0x64b   :  { %4045 = vmatprep.subr.bf16.mxu0 %v5373_v14  ;;  %4077 = vmatprep.subr.bf16.mxu1 %v5402_v48 }
 0x64e   :  { %4047 = vmatpush1.bf16.msra.mxu0 %v5400_v19  ;;  %4079 = vmatpush1.bf16.msra.mxu1 %v5406_v35 }
 0x64f   :  { %4081 = vmatprep.subr.bf16.mxu0 %v5059_v15  ;;  %4113 = vmatprep.subr.bf16.mxu1 %v5068_v18 }
 0x703   :  { %v1922_v29 = vpop.f32.mrb[36].mxu0  ;;  %v1999_v22 = vpop.f32.mrb[26].mxu1 }
 0x704   :  { %v4358_v49 = vadd.f32 %v1922_v29, %v5496_v16  ;;  %v1924_v54 = vpop.f32.mrb[37].mxu0  ;;  %v2001_v10 = vpop.f32.mrb[27].mxu1  ;;  %v4390_v39 = vadd.f32 %v1999_v22, %v5509_v61 }
 0x705   :  { %v4359_v44 = vadd.f32 %v1924_v54, %v5498_v20  ;;  %v4391_v33 = vadd.f32 %v2001_v10, %v5503_v40 }
 0x706   :  { %v3340_v59 = vmul.f32 -1.442695, %v4358_v49 }
 0x707   :  { %v3342_v60 = vmul.f32 -1.442695, %v4359_v44  ;;  %v1928_v36 = vpop.f32.mrb[38].mxu0  ;;  %v2005_v57 = vpop.f32.mrb[28].mxu1  ;;  %v3344_v62 = vmul.f32 -1.442695, %v4391_v33 }
 0x708   :  { %4669 = vpow2.f32 %v3340_v59  ;;  %v4360_v1 = vadd.f32 %v1928_v36, %v5496_v16  ;;  %v1930_v11 = vpop.f32.mrb[39].mxu0  ;;  %v2007_v47 = vpop.f32.mrb[29].mxu1  ;;  %v4392_v49 = vadd.f32 %v2005_v57, %v5509_v61 }
 0x709   :  { %4671 = vpow2.f32 %v3342_v60  ;;  %v4361_v25 = vadd.f32 %v1930_v11, %v5498_v20  ;;  %v4393_v38 = vadd.f32 %v2007_v47, %v5503_v40 }
 0x70a   :  { %v3341_v58 = vmul.f32 -1.442695, %v4360_v1 }
 0x70b   :  { %v3343_v37 = vmul.f32 -1.442695, %v4361_v25  ;;  %v3345_v42 = vmul.f32 -1.442695, %v4393_v38 }
 0x70c   :  { %4673 = vpow2.f32 %v3341_v58 }
 0x70d   :  { %4675 = vpow2.f32 %v3343_v37 }
 0x70e   :  { %4677 = vpow2.f32 %v3344_v62 }
 0x70f   :  { %4679 = vtanh.f32 %v4390_v39 }
 0x712   :  { %v4670_v43 = vpop.eup %4669 }
 0x713   :  { %v4672_v21 = vpop.eup %4671  ;;  %v2024_v41 = vadd.f32 1.0, %v4670_v43 }
 0x714   :  { %v2036_v29 = vadd.f32 1.0, %v4672_v21 }
 0x715   :  { %4681 = vrcp.f32 %v2024_v41 }
 0x716   :  { %v4674_v54 = vpop.eup %4673  ;;  %4683 = vrcp.f32 %v2036_v29 }
 0x717   :  { %v4676_v10 = vpop.eup %4675  ;;  %v2025_v44 = vadd.f32 1.0, %v4674_v54  ;;  %4685 = vpow2.f32 %v3345_v42 }
 0x718   :  { %4687 = vtanh.f32 %v4392_v49  ;;  %v2037_v59 = vadd.f32 1.0, %v4676_v10  ;;  %v4678_v22 = vpop.eup %4677 }
 0x719   :  { %4689 = vrcp.f32 %v2025_v44  ;;  %v4680_v60 = vpop.eup %4679  ;;  %v2050_v47 = vadd.f32 1.0, %v4678_v22 }
 0x71a   :  { %4691 = vrcp.f32 %v2037_v59 }
 0x71b   :  { %4693 = vrcp.f32 %v2050_v47 }
 0x71f   :  { %v4682_v36 = vpop.eup %4681 }
 0x720   :  { %v4684_v1 = vpop.eup %4683  ;;  %v2058_v11 = vmul.f32 %v4682_v36, %v4680_v60 }
 0x721   :  { %v4686_v25 = vpop.eup %4685  ;;  %v2056_v58 = vmul.f32 %v4684_v1, %v5669_v26 }
 0x722   :  { %v4688_v57 = vpop.eup %4687  ;;  %v2051_v39 = vadd.f32 1.0, %v4686_v25 }
 0x723   :  { %v4690_v33 = vpop.eup %4689  ;;  %v5721_v37 = vadd.f32 %v2058_v11, %v2056_v58 }
 0x724   :  { %v4692_v62 = vpop.eup %4691  ;;  %v2059_v38 = vmul.f32 %v4690_v33, %v4688_v57 }
 0x725   :  { %4695 = vtanh.f32 %v5721_v37  ;;  %v2057_v43 = vmul.f32 %v4692_v62, %v5673_v0  ;;  %v4694_v41 = vpop.eup %4693 }
 0x726   :  { %4697 = vrcp.f32 %v2051_v39 }
 0x727   :  { %v5725_v21 = vadd.f32 %v2059_v38, %v2057_v43 }
 0x729   :  { %4699 = vtanh.f32 %v5725_v21 }
 0x72f   :  { %v4696_v42 = vpop.eup %4695 }
 0x730   :  { %v2064_v26 = vmul.f32 %v4696_v42, %v4694_v41  ;;  %v4698_v29 = vpop.eup %4697 }
 0x732   :  { %2131 = vmatmul.mubr.f32.vlgmr.msra.gmra.mrb[40].mxu0 %v2064_v26  ;;  %2208 = vmatmul.mubr.f32.vlgmr.msra.gmra.mrb[30].mxu1 %v2064_v26 }
 0x733   :  { %v4700_v49 = vpop.eup %4699  ;;  %2136 = vmatprep.mubr.f32.mxu0 %v4825_v12  ;;  %2213 = vmatprep.mubr.f32.mxu1 %v4825_v12 }
 0x734   :  { %v2065_v54 = vmul.f32 %v4700_v49, %v4698_v29  ;;  %4083 = vmatpush1.bf16.msra.mxu0 %v5117_v4  ;;  %4115 = vmatpush1.bf16.msra.mxu1 %v5130_v13 }
 0x735   :  { %4085 = vmatprep.subr.bf16.mxu0 %v5119_v6  ;;  %4117 = vmatprep.subr.bf16.mxu1 %v5165_v28 }
 0x736   :  { %2137 = vmatmul.mubr.f32.gmra.mrb[42].mxu0 %v2065_v54  ;;  %2214 = vmatmul.mubr.f32.gmra.mrb[32].mxu1 %v2065_v54 }
 0x737   :  { %2340 = vmatprep.mubr.f32.mxu0 %v4825_v12  ;;  %2417 = vmatprep.mubr.f32.mxu1 %v4825_v12 }
 0x738   :  { %4087 = vmatpush1.bf16.msra.mxu0 %v5155_v24  ;;  %4119 = vmatpush1.bf16.msra.mxu1 %v5173_v32 }
 0x739   :  { %4089 = vmatprep.subr.bf16.mxu0 %v5167_v30  ;;  %4121 = vmatprep.subr.bf16.mxu1 %v5204_v51 }
 0x73c   :  { %4091 = vmatpush1.bf16.msra.mxu0 %v5195_v46  ;;  %4123 = vmatpush1.bf16.msra.mxu1 %v5213_v55 }
 0x73d   :  { %4093 = vmatprep.subr.bf16.mxu0 %v5207_v53  ;;  %4125 = vmatprep.subr.bf16.mxu1 %v5248_v2 }
 0x740   :  { %4095 = vmatpush1.bf16.msra.mxu0 %v5239_v63  ;;  %4127 = vmatpush1.bf16.msra.mxu1 %v5257_v7 }
 0x741   :  { %4097 = vmatprep.subr.bf16.mxu0 %v5251_v5  ;;  %4129 = vmatprep.subr.bf16.mxu1 %v5288_v27 }
 0x744   :  { %4099 = vmatpush1.bf16.msra.mxu0 %v5279_v23  ;;  %4131 = vmatpush1.bf16.msra.mxu1 %v5297_v34 }
 0x745   :  { %4101 = vmatprep.subr.bf16.mxu0 %v5291_v31  ;;  %4133 = vmatprep.subr.bf16.mxu1 %v5332_v52 }
 0x748   :  { %4103 = vmatpush1.bf16.msra.mxu0 %v5323_v45  ;;  %4135 = vmatpush1.bf16.msra.mxu1 %v5338_v56 }
 0x749   :  { %4105 = vmatprep.subr.bf16.mxu0 %v5335_v50  ;;  %4137 = vmatprep.subr.bf16.mxu1 %v5366_v9 }
 0x74c   :  { %4107 = vmatpush1.bf16.msra.mxu0 %v5363_v8  ;;  %4139 = vmatpush1.bf16.msra.mxu1 %v5378_v17 }
 0x74d   :  { %4109 = vmatprep.subr.bf16.mxu0 %v5373_v14  ;;  %4141 = vmatprep.subr.bf16.mxu1 %v5402_v48 }
 0x750   :  { %4111 = vmatpush1.bf16.msra.mxu0 %v5400_v19  ;;  %4143 = vmatpush1.bf16.msra.mxu1 %v5406_v35 }
 0x751   :  { %4145 = vmatprep.subr.bf16.mxu0 %v5059_v15  ;;  %4177 = vmatprep.subr.bf16.mxu1 %v5068_v18 }
 0x805   :  { %v2132_v0 = vpop.f32.mrb[40].mxu0  ;;  %v2209_v10 = vpop.f32.mrb[30].mxu1 }
 0x806   :  { %v4362_v44 = vadd.f32 %v2132_v0, %v5496_v16  ;;  %v2134_v59 = vpop.f32.mrb[41].mxu0  ;;  %v2211_v22 = vpop.f32.mrb[31].mxu1  ;;  %v4394_v43 = vadd.f32 %v2209_v10, %v5509_v61 }
 0x807   :  { %v4363_v60 = vadd.f32 %v2134_v59, %v5498_v20  ;;  %v4395_v33 = vadd.f32 %v2211_v22, %v5503_v40 }
 0x808   :  { %v3346_v36 = vmul.f32 -1.442695, %v4362_v44 }
 0x809   :  { %v3348_v1 = vmul.f32 -1.442695, %v4363_v60  ;;  %v2138_v11 = vpop.f32.mrb[42].mxu0  ;;  %v2215_v47 = vpop.f32.mrb[32].mxu1  ;;  %v3350_v38 = vmul.f32 -1.442695, %v4395_v33 }
 0x80a   :  { %4701 = vpow2.f32 %v3346_v36  ;;  %v4364_v25 = vadd.f32 %v2138_v11, %v5496_v16  ;;  %v2140_v58 = vpop.f32.mrb[43].mxu0  ;;  %v2217_v57 = vpop.f32.mrb[33].mxu1  ;;  %v4396_v54 = vadd.f32 %v2215_v47, %v5509_v61 }
 0x80b   :  { %4703 = vpow2.f32 %v3348_v1  ;;  %v4365_v15 = vadd.f32 %v2140_v58, %v5498_v20  ;;  %v4397_v39 = vadd.f32 %v2217_v57, %v5503_v40 }
 0x80c   :  { %v3347_v18 = vmul.f32 -1.442695, %v4364_v25 }
 0x80d   :  { %v3349_v62 = vmul.f32 -1.442695, %v4365_v15  ;;  %v3351_v29 = vmul.f32 -1.442695, %v4397_v39 }
 0x80e   :  { %4705 = vpow2.f32 %v3347_v18 }
 0x80f   :  { %4707 = vpow2.f32 %v3349_v62 }
 0x810   :  { %4709 = vpow2.f32 %v3350_v38 }
 0x811   :  { %4711 = vtanh.f32 %v4394_v43 }
 0x814   :  { %v4702_v41 = vpop.eup %4701 }
 0x815   :  { %v4704_v42 = vpop.eup %4703  ;;  %v2234_v26 = vadd.f32 1.0, %v4702_v41 }
 0x816   :  { %v2246_v49 = vadd.f32 1.0, %v4704_v42 }
 0x817   :  { %4713 = vrcp.f32 %v2234_v26 }
 0x818   :  { %v4706_v0 = vpop.eup %4705  ;;  %4715 = vrcp.f32 %v2246_v49 }
 0x819   :  { %v4708_v44 = vpop.eup %4707  ;;  %v2235_v59 = vadd.f32 1.0, %v4706_v0  ;;  %4717 = vpow2.f32 %v3351_v29 }
 0x81a   :  { %4719 = vtanh.f32 %v4396_v54  ;;  %v2247_v22 = vadd.f32 1.0, %v4708_v44  ;;  %v4710_v10 = vpop.eup %4709 }
 0x81b   :  { %4721 = vrcp.f32 %v2235_v59  ;;  %v4712_v60 = vpop.eup %4711  ;;  %v2260_v25 = vadd.f32 1.0, %v4710_v10 }
 0x81c   :  { %4723 = vrcp.f32 %v2247_v22 }
 0x81d   :  { %4725 = vrcp.f32 %v2260_v25 }
 0x821   :  { %v4714_v36 = vpop.eup %4713 }
 0x822   :  { %v4716_v1 = vpop.eup %4715  ;;  %v2268_v11 = vmul.f32 %v4714_v36, %v4712_v60 }
 0x823   :  { %v4718_v58 = vpop.eup %4717  ;;  %v2266_v57 = vmul.f32 %v4716_v1, %v5721_v37 }
 0x824   :  { %v4720_v47 = vpop.eup %4719  ;;  %v2261_v38 = vadd.f32 1.0, %v4718_v58 }
 0x825   :  { %v4722_v15 = vpop.eup %4721  ;;  %v5773_v18 = vadd.f32 %v2268_v11, %v2266_v57 }
 0x826   :  { %v4724_v33 = vpop.eup %4723  ;;  %v2269_v62 = vmul.f32 %v4722_v15, %v4720_v47 }
 0x827   :  { %4727 = vtanh.f32 %v5773_v18  ;;  %v2267_v39 = vmul.f32 %v4724_v33, %v5725_v21  ;;  %v4726_v41 = vpop.eup %4725 }
 0x828   :  { %4729 = vrcp.f32 %v2261_v38 }
 0x829   :  { %v5777_v43 = vadd.f32 %v2269_v62, %v2267_v39 }
 0x82b   :  { %4731 = vtanh.f32 %v5777_v43 }
 0x831   :  { %v4728_v42 = vpop.eup %4727 }
 0x832   :  { %v2274_v37 = vmul.f32 %v4728_v42, %v4726_v41  ;;  %v4730_v26 = vpop.eup %4729  ;;  %v2790_v42 = vld [vmem:[%s6230_s7 + $0x88] sm:$0xff] }
 0x834   :  { %2341 = vmatmul.mubr.f32.vlgmr.msra.gmra.mrb[44].mxu0 %v2274_v37  ;;  %2418 = vmatmul.mubr.f32.vlgmr.msra.gmra.mrb[34].mxu1 %v2274_v37 }
 0x835   :  { %v4732_v29 = vpop.eup %4731  ;;  %2346 = vmatprep.mubr.f32.mxu0 %v4825_v12  ;;  %2423 = vmatprep.mubr.f32.mxu1 %v4825_v12 }
 0x836   :  { %v2275_v49 = vmul.f32 %v4732_v29, %v4730_v26  ;;  %4147 = vmatpush1.bf16.msra.mxu0 %v5117_v4  ;;  %4179 = vmatpush1.bf16.msra.mxu1 %v5130_v13  ;;  %v2773_v26 = vld [vmem:[%s6230_s7] sm:$0xff]  ;;  %v2774_v29 = vld [vmem:[%s6230_s7 + $0x8] sm:$0xff] }
 0x837   :  { %4149 = vmatprep.subr.bf16.mxu0 %v5119_v6  ;;  %4181 = vmatprep.subr.bf16.mxu1 %v5165_v28 }
 0x838   :  { %2347 = vmatmul.mubr.f32.gmra.mrb[46].mxu0 %v2275_v49  ;;  %2424 = vmatmul.mubr.f32.gmra.mrb[36].mxu1 %v2275_v49  ;;  %v4210_v49 = vpack.c.bf16 %v2774_v29, %v2773_v26  ;;  %v2799_v29 = vld [vmem:[%s6230_s7 + $0xd0] sm:$0xff] }
 0x839   :  { %2550 = vmatprep.mubr.f32.mxu0 %v4825_v12  ;;  %2627 = vmatprep.mubr.f32.mxu1 %v4825_v12 }
 0x83a   :  { %4151 = vmatpush1.bf16.msra.mxu0 %v5155_v24  ;;  %4183 = vmatpush1.bf16.msra.mxu1 %v5173_v32 }
 0x83b   :  { %4153 = vmatprep.subr.bf16.mxu0 %v5167_v30  ;;  %4185 = vmatprep.subr.bf16.mxu1 %v5204_v51 }
 0x83e   :  { %4155 = vmatpush1.bf16.msra.mxu0 %v5195_v46  ;;  %4187 = vmatpush1.bf16.msra.mxu1 %v5213_v55 }
 0x83f   :  { %4157 = vmatprep.subr.bf16.mxu0 %v5207_v53  ;;  %4189 = vmatprep.subr.bf16.mxu1 %v5248_v2 }
 0x842   :  { %4159 = vmatpush1.bf16.msra.mxu0 %v5239_v63  ;;  %4191 = vmatpush1.bf16.msra.mxu1 %v5257_v7 }
 0x843   :  { %4161 = vmatprep.subr.bf16.mxu0 %v5251_v5  ;;  %4193 = vmatprep.subr.bf16.mxu1 %v5288_v27 }
 0x846   :  { %4163 = vmatpush1.bf16.msra.mxu0 %v5279_v23  ;;  %4195 = vmatpush1.bf16.msra.mxu1 %v5297_v34 }
 0x847   :  { %4165 = vmatprep.subr.bf16.mxu0 %v5291_v31  ;;  %4197 = vmatprep.subr.bf16.mxu1 %v5332_v52 }
 0x84a   :  { %4167 = vmatpush1.bf16.msra.mxu0 %v5323_v45  ;;  %4199 = vmatpush1.bf16.msra.mxu1 %v5338_v56 }
 0x84b   :  { %4169 = vmatprep.subr.bf16.mxu0 %v5335_v50  ;;  %4201 = vmatprep.subr.bf16.mxu1 %v5366_v9 }
 0x84e   :  { %4171 = vmatpush1.bf16.msra.mxu0 %v5363_v8  ;;  %4203 = vmatpush1.bf16.msra.mxu1 %v5378_v17 }
 0x84f   :  { %4173 = vmatprep.subr.bf16.mxu0 %v5373_v14  ;;  %4205 = vmatprep.subr.bf16.mxu1 %v5402_v48 }
 0x852   :  { %4175 = vmatpush1.bf16.msra.mxu0 %v5400_v19  ;;  %4207 = vmatpush1.bf16.msra.mxu1 %v5406_v35 }
 0x907   :  { %v2342_v4 = vpop.f32.mrb[44].mxu0  ;;  %v2419_v6 = vpop.f32.mrb[34].mxu1 }
 0x908   :  { %v4366_v13 = vadd.f32 %v2342_v4, %v5496_v16  ;;  %v2344_v24 = vpop.f32.mrb[45].mxu0  ;;  %v2421_v28 = vpop.f32.mrb[35].mxu1  ;;  %v4398_v45 = vadd.f32 %v2419_v6, %v5509_v61  ;;  %v2821_v4 = vld [vmem:[%s6230_s7 + $0x180] sm:$0xff]  ;;  %v2822_v6 = vld [vmem:[%s6230_s7 + $0x188] sm:$0xff] }
 0x909   :  { %v4367_v30 = vadd.f32 %v2344_v24, %v5498_v20  ;;  %v4399_v23 = vadd.f32 %v2421_v28, %v5503_v40  ;;  %v2805_v24 = vld [vmem:[%s6230_s7 + $0x100] sm:$0xff]  ;;  %v2806_v28 = vld [vmem:[%s6230_s7 + $0x108] sm:$0xff] }
 0x90a   :  { %v3352_v32 = vmul.f32 -1.442695, %v4366_v13  ;;  %v4240_v13 = vpack.c.bf16 %v2822_v6, %v2821_v4  ;;  %v2783_v6 = vld [vmem:[%s6230_s7 + $0x50] sm:$0xff] }
 0x90b   :  { %v3354_v46 = vmul.f32 -1.442695, %v4367_v30  ;;  %v2348_v51 = vpop.f32.mrb[46].mxu0  ;;  %v2425_v53 = vpop.f32.mrb[36].mxu1  ;;  %v3356_v31 = vmul.f32 -1.442695, %v4399_v23  ;;  %v4242_v30 = vpack.c.bf16 %v2806_v28, %v2805_v24 }
 0x90c   :  { %4733 = vpow2.f32 %v3352_v32  ;;  %v4368_v55 = vadd.f32 %v2348_v51, %v5496_v16  ;;  %v2350_v63 = vpop.f32.mrb[47].mxu0  ;;  %v2427_v2 = vpop.f32.mrb[37].mxu1  ;;  %v4400_v14 = vadd.f32 %v2425_v53, %v5509_v61  ;;  %v2791_v32 = vld [vmem:[%s6230_s7 + $0x90] sm:$0xff]  ;;  %4241 = vmatprep.subr.bf16.mxu1 %v4240_v13  ;;  %v2784_v13 = vld [vmem:[%s6230_s7 + $0x58] sm:$0xff] }
 0x90d   :  { %4735 = vpow2.f32 %v3354_v46  ;;  %v4369_v5 = vadd.f32 %v2350_v63, %v5498_v20  ;;  %v4401_v34 = vadd.f32 %v2427_v2, %v5503_v40  ;;  %v2792_v46 = vld [vmem:[%s6230_s7 + $0x98] sm:$0xff]  ;;  %v2775_v53 = vld [vmem:[%s6230_s7 + $0x10] sm:$0xff]  ;;  %v4230_v24 = vpack.c.bf16 %v2784_v13, %v2783_v6 }
 0x90e   :  { %v3353_v7 = vmul.f32 -1.442695, %v4368_v55  ;;  %v4212_v51 = vpack.c.bf16 %v2792_v46, %v2791_v32  ;;  %v2776_v55 = vld [vmem:[%s6230_s7 + $0x18] sm:$0xff]  ;;  %v2823_v2 = vld [vmem:[%s6230_s7 + $0x190] sm:$0xff] }
 0x90f   :  { %v3355_v27 = vmul.f32 -1.442695, %v4369_v5  ;;  %v3357_v8 = vmul.f32 -1.442695, %v4401_v34  ;;  %v4214_v63 = vpack.c.bf16 %v2776_v55, %v2775_v53  ;;  %v2824_v5 = vld [vmem:[%s6230_s7 + $0x198] sm:$0xff]  ;;  %v2807_v23 = vld [vmem:[%s6230_s7 + $0x110] sm:$0xff] }
 0x910   :  { %4737 = vpow2.f32 %v3353_v7  ;;  %v4244_v7 = vpack.c.bf16 %v2824_v5, %v2823_v2  ;;  %v2793_v34 = vld [vmem:[%s6230_s7 + $0xa0] sm:$0xff]  ;;  %v2831_v28 = vld [vmem:[%s6230_s7 + $0x1d0] sm:$0xff] }
 0x911   :  { %4739 = vpow2.f32 %v3355_v27  ;;  %v2808_v27 = vld [vmem:[%s6230_s7 + $0x118] sm:$0xff]  ;;  %v2815_v46 = vld [vmem:[%s6230_s7 + $0x150] sm:$0xff]  ;;  %v2801_v55 = vld [vmem:[%s6230_s7 + $0xe0] sm:$0xff] }
 0x912   :  { %4741 = vpow2.f32 %v3356_v31  ;;  %v4246_v31 = vpack.c.bf16 %v2808_v27, %v2807_v23  ;;  %v2785_v5 = vld [vmem:[%s6230_s7 + $0x60] sm:$0xff] }
 0x913   :  { %4743 = vtanh.f32 %v4398_v45  ;;  %v2794_v45 = vld [vmem:[%s6230_s7 + $0xa8] sm:$0xff]  ;;  %v2833_v23 = vld [vmem:[%s6230_s7 + $0x1e0] sm:$0xff] }
 0x916   :  { %v4734_v52 = vpop.eup %4733 }
 0x917   :  { %v4736_v50 = vpop.eup %4735  ;;  %v2444_v56 = vadd.f32 1.0, %v4734_v52  ;;  %v4216_v52 = vpack.c.bf16 %v2794_v45, %v2793_v34  ;;  %v2817_v34 = vld [vmem:[%s6230_s7 + $0x160] sm:$0xff]  ;;  %v2818_v45 = vld [vmem:[%s6230_s7 + $0x168] sm:$0xff] }
 0x918   :  { %v2456_v9 = vadd.f32 1.0, %v4736_v50  ;;  %v2777_v50 = vld [vmem:[%s6230_s7 + $0x20] sm:$0xff] }
 0x919   :  { %4745 = vrcp.f32 %v2444_v56  ;;  %v2778_v56 = vld [vmem:[%s6230_s7 + $0x28] sm:$0xff] }
 0x91a   :  { %v4738_v17 = vpop.eup %4737  ;;  %4747 = vrcp.f32 %v2456_v9  ;;  %v2825_v9 = vld [vmem:[%s6230_s7 + $0x1a0] sm:$0xff] }
 0x91b   :  { %v4740_v19 = vpop.eup %4739  ;;  %v2445_v48 = vadd.f32 1.0, %v4738_v17  ;;  %4749 = vpow2.f32 %v3357_v8  ;;  %v4218_v8 = vpack.c.bf16 %v2778_v56, %v2777_v50  ;;  %v4266_v50 = vpack.c.bf16 %v2818_v45, %v2817_v34  ;;  %v2803_v56 = vld [vmem:[%s6230_s7 + $0xf0] sm:$0xff] }
 0x91c   :  { %4751 = vtanh.f32 %v4400_v14  ;;  %v2457_v35 = vadd.f32 1.0, %v4740_v19  ;;  %v4742_v21 = vpop.eup %4741  ;;  %v2826_v14 = vld [vmem:[%s6230_s7 + $0x1a8] sm:$0xff]  ;;  %v2809_v19 = vld [vmem:[%s6230_s7 + $0x120] sm:$0xff] }
 0x91d   :  { %4753 = vrcp.f32 %v2445_v48  ;;  %v4744_v54 = vpop.eup %4743  ;;  %v2470_v22 = vadd.f32 1.0, %v4742_v21  ;;  %v4248_v17 = vpack.c.bf16 %v2826_v14, %v2825_v9  ;;  %v2810_v48 = vld [vmem:[%s6230_s7 + $0x128] sm:$0xff]  ;;  %v2795_v21 = vld [vmem:[%s6230_s7 + $0xb0] sm:$0xff] }
 0x91e   :  { %4755 = vrcp.f32 %v2457_v35  ;;  %v4250_v35 = vpack.c.bf16 %v2810_v48, %v2809_v19  ;;  %v2787_v9 = vld [vmem:[%s6230_s7 + $0x70] sm:$0xff]  ;;  %v2836_v48 = vld [vmem:[%s6230_s7 + $0x1f8] sm:$0xff] }
 0x91f   :  { %4757 = vrcp.f32 %v2470_v22  ;;  %v2835_v19 = vld [vmem:[%s6230_s7 + $0x1f0] sm:$0xff] }
 0x923   :  { %v4746_v0 = vpop.eup %4745 }
 0x924   :  { %v4748_v44 = vpop.eup %4747  ;;  %v2478_v59 = vmul.f32 %v4746_v0, %v4744_v54  ;;  %v2796_v54 = vld [vmem:[%s6230_s7 + $0xb8] sm:$0xff] }
 0x925   :  { %v4750_v10 = vpop.eup %4749  ;;  %v2476_v60 = vmul.f32 %v4748_v44, %v5773_v18  ;;  %v4220_v0 = vpack.c.bf16 %v2796_v54, %v2795_v21  ;;  %v2779_v44 = vld [vmem:[%s6230_s7 + $0x30] sm:$0xff]  ;;  %v4268_v21 = vpack.c.bf16 %v2836_v48, %v2835_v19 }
 0x926   :  { %v4752_v36 = vpop.eup %4751  ;;  %v2471_v57 = vadd.f32 1.0, %v4750_v10  ;;  %v2827_v10 = vld [vmem:[%s6230_s7 + $0x1b0] sm:$0xff] }
 0x927   :  { %v4754_v1 = vpop.eup %4753  ;;  %v5823_v11 = vadd.f32 %v2478_v59, %v2476_v60  ;;  %v2780_v59 = vld [vmem:[%s6230_s7 + $0x38] sm:$0xff]  ;;  %v2819_v54 = vld [vmem:[%s6230_s7 + $0x170] sm:$0xff] }
 0x928   :  { %v4756_v25 = vpop.eup %4755  ;;  %v2479_v58 = vmul.f32 %v4754_v1, %v4752_v36  ;;  %v4222_v22 = vpack.c.bf16 %v2780_v59, %v2779_v44  ;;  %v2828_v60 = vld [vmem:[%s6230_s7 + $0x1b8] sm:$0xff]  ;;  %v2811_v1 = vld [vmem:[%s6230_s7 + $0x130] sm:$0xff]  ;;  %v2853_v59 = vld [vmem:[%s6230_s7 + $0x280] sm:$0xff] }
 0x929   :  { %4759 = vtanh.f32 %v5823_v11  ;;  %v2477_v47 = vmul.f32 %v4756_v25, %v5777_v43  ;;  %v4758_v33 = vpop.eup %4757  ;;  %v2789_v43 = vld [vmem:[%s6230_s7 + $0x80] sm:$0xff]  ;;  %v4252_v36 = vpack.c.bf16 %v2828_v60, %v2827_v10  ;;  %v2812_v25 = vld [vmem:[%s6230_s7 + $0x138] sm:$0xff]  ;;  %v4826_v60 = vmov 0.0|0.0  }
 0x92a   :  { %4761 = vrcp.f32 %v2471_v57  ;;  %v4208_v37 = vpack.c.bf16 %v2790_v42, %v2789_v43  ;;  %v2797_v57 = vld [vmem:[%s6230_s7 + $0xc0] sm:$0xff] }
 0x92b   :  { %v5827_v15 = vadd.f32 %v2479_v58, %v2477_v47  ;;  %v4254_v58 = vpack.c.bf16 %v2812_v25, %v2811_v1  ;;  %v2798_v47 = vld [vmem:[%s6230_s7 + $0xc8] sm:$0xff]  ;;  %v2813_v42 = vld [vmem:[%s6230_s7 + $0x140] sm:$0xff] }
 0x92c   :  { %4209 = vmatprep.subr.bf16.mxu0 %v4208_v37  ;;  %v2814_v37 = vld [vmem:[%s6230_s7 + $0x148] sm:$0xff] }
 0x92d   :  { %4763 = vtanh.f32 %v5827_v15  ;;  %v4258_v26 = vpack.c.bf16 %v2814_v37, %v2813_v42 }
 0x933   :  { %v4760_v62 = vpop.eup %4759 }
 0x934   :  { %v2484_v18 = vmul.f32 %v4760_v62, %v4758_v33  ;;  %v4762_v38 = vpop.eup %4761  ;;  %v4224_v33 = vpack.c.bf16 %v2798_v47, %v2797_v57  ;;  %v2781_v62 = vld [vmem:[%s6230_s7 + $0x40] sm:$0xff] }
 0x936   :  { %2551 = vmatmul.mubr.f32.vlgmr.msra.gmra.mrb[48].mxu0 %v2484_v18  ;;  %2628 = vmatmul.mubr.f32.vlgmr.msra.gmra.mrb[38].mxu1 %v2484_v18  ;;  %v2782_v18 = vld [vmem:[%s6230_s7 + $0x48] sm:$0xff] }
 0x937   :  { %v4764_v39 = vpop.eup %4763  ;;  %2556 = vmatprep.mubr.f32.mxu0 %v4825_v12  ;;  %2633 = vmatprep.mubr.f32.mxu1 %v4825_v12 }
 0x938   :  { %v2485_v41 = vmul.f32 %v4764_v39, %v4762_v38  ;;  %4211 = vmatpush3.bf16.msra.mxu0 %v4210_v49  ;;  %4243 = vmatpush3.bf16.msra.mxu1 %v4242_v30  ;;  %v4226_v38 = vpack.c.bf16 %v2782_v18, %v2781_v62  ;;  %v2829_v39 = vld [vmem:[%s6230_s7 + $0x1c0] sm:$0xff]  ;;  %v2800_v49 = vld [vmem:[%s6230_s7 + $0xd8] sm:$0xff] }
 0x939   :  { %4213 = vmatprep.subr.bf16.mxu0 %v4212_v51  ;;  %4245 = vmatprep.subr.bf16.mxu1 %v4244_v7  ;;  %v4228_v4 = vpack.c.bf16 %v2800_v49, %v2799_v29  ;;  %v2832_v30 = vld [vmem:[%s6230_s7 + $0x1d8] sm:$0xff]  ;;  %v2786_v7 = vld [vmem:[%s6230_s7 + $0x68] sm:$0xff] }
 0x93a   :  { %2557 = vmatmul.mubr.f32.gmra.mrb[50].mxu0 %v2485_v41  ;;  %2634 = vmatmul.mubr.f32.gmra.mrb[40].mxu1 %v2485_v41  ;;  %v2830_v41 = vld [vmem:[%s6230_s7 + $0x1c8] sm:$0xff]  ;;  %v4260_v32 = vpack.c.bf16 %v2832_v30, %v2831_v28  ;;  %v2816_v51 = vld [vmem:[%s6230_s7 + $0x158] sm:$0xff]  ;;  %v4234_v27 = vpack.c.bf16 %v2786_v7, %v2785_v5 }
 0x93b   :  { %v4256_v43 = vpack.c.bf16 %v2830_v41, %v2829_v39  ;;  %v4262_v53 = vpack.c.bf16 %v2816_v51, %v2815_v46 }
 0x93c   :  { %4215 = vmatpush3.bf16.msra.mxu0 %v4214_v63  ;;  %4247 = vmatpush3.bf16.msra.mxu1 %v4246_v31  ;;  %v2802_v63 = vld [vmem:[%s6230_s7 + $0xe8] sm:$0xff] }
 0x93d   :  { %4217 = vmatprep.subr.bf16.mxu0 %v4216_v52  ;;  %4249 = vmatprep.subr.bf16.mxu1 %v4248_v17  ;;  %v4232_v2 = vpack.c.bf16 %v2802_v63, %v2801_v55  ;;  %v2834_v31 = vld [vmem:[%s6230_s7 + $0x1e8] sm:$0xff]  ;;  %v2788_v17 = vld [vmem:[%s6230_s7 + $0x78] sm:$0xff] }
 0x93e   :  { %v4264_v52 = vpack.c.bf16 %v2834_v31, %v2833_v23 }
 0x940   :  { %4219 = vmatpush3.bf16.msra.mxu0 %v4218_v8  ;;  %4251 = vmatpush3.bf16.msra.mxu1 %v4250_v35  ;;  %v2804_v8 = vld [vmem:[%s6230_s7 + $0xf8] sm:$0xff]  ;;  %v4238_v35 = vpack.c.bf16 %v2788_v17, %v2787_v9 }
 0x941   :  { %4221 = vmatprep.subr.bf16.mxu0 %v4220_v0  ;;  %4253 = vmatprep.subr.bf16.mxu1 %v4252_v36  ;;  %v4236_v14 = vpack.c.bf16 %v2804_v8, %v2803_v56  ;;  %v2820_v0 = vld [vmem:[%s6230_s7 + $0x178] sm:$0xff]  ;;  %v4827_v8 = vmov 1983009808  }
 0x942   :  { %v4270_v44 = vpack.c.bf16 %v2820_v0, %v2819_v54  ;;  %v2699_v9 = vunpack.c.l.s4 %v4827_v8  ;;  %v2843_v8 = vld [vmem:[%s6230_s7 + $0x230] sm:$0xff] }
 0x944   :  { %4223 = vmatpush3.bf16.msra.mxu0 %v4222_v22  ;;  %4255 = vmatpush3.bf16.msra.mxu1 %v4254_v58  ;;  %v2854_v22 = vld [vmem:[%s6230_s7 + $0x288] sm:$0xff]  ;;  %v2700_v17 = vunpack.c.0.s8 %v2699_v9  ;;  %v2844_v9 = vld [vmem:[%s6230_s7 + $0x238] sm:$0xff] }
 0x945   :  { %4225 = vmatprep.subr.bf16.mxu0 %v4224_v33  ;;  %4257 = vmatprep.subr.bf16.mxu1 %v4256_v43  ;;  %v4272_v10 = vpack.c.bf16 %v2854_v22, %v2853_v59 }
 0x946   :  { %v6042_v48 = vsub.s32 %v2700_v17, %v5489_v3  ;;  %v2861_v17 = vld [vmem:[%s6230_s7 + $0x2c0] sm:$0xff] }
 0x948   :  { %4227 = vmatpush3.bf16.msra.mxu0 %v4226_v38  ;;  %4259 = vmatpush3.bf16.msra.mxu1 %v4258_v26 }
 0x949   :  { %4229 = vmatprep.subr.bf16.mxu0 %v4228_v4  ;;  %4261 = vmatprep.subr.bf16.mxu1 %v4260_v32 }
 0x94c   :  { %4231 = vmatpush3.bf16.msra.mxu0 %v4230_v24  ;;  %4263 = vmatpush3.bf16.msra.mxu1 %v4262_v53 }
 0x94d   :  { %4233 = vmatprep.subr.bf16.mxu0 %v4232_v2  ;;  %4265 = vmatprep.subr.bf16.mxu1 %v4264_v52 }
 0x950   :  { %4235 = vmatpush3.bf16.msra.mxu0 %v4234_v27  ;;  %4267 = vmatpush3.bf16.msra.mxu1 %v4266_v50 }
 0x951   :  { %4237 = vmatprep.subr.bf16.mxu0 %v4236_v14  ;;  %4269 = vmatprep.subr.bf16.mxu1 %v4268_v21 }
 0x954   :  { %4239 = vmatpush3.bf16.msra.mxu0 %v4238_v35  ;;  %4271 = vmatpush3.bf16.msra.mxu1 %v4270_v44 }
 0x955   :  { %4273 = vmatprep.subr.bf16.mxu0 %v4272_v10  ;;  %4304 = vmatprep.subr.bf16.mxu1 %v4826_v60 }
 0xa09   :  { %v2552_v36 = vpop.f32.mrb[48].mxu0  ;;  %v2629_v1 = vpop.f32.mrb[38].mxu1 }
 0xa0a   :  { %v4370_v25 = vadd.f32 %v2552_v36, %v5496_v16  ;;  %v2554_v58 = vpop.f32.mrb[49].mxu0  ;;  %v2631_v57 = vpop.f32.mrb[39].mxu1  ;;  %v4402_v6 = vadd.f32 %v2629_v1, %v5509_v61 }
 0xa0b   :  { %v4371_v47 = vadd.f32 %v2554_v58, %v5498_v20  ;;  %v4403_v26 = vadd.f32 %v2631_v57, %v5503_v40 }
 0xa0c   :  { %v3358_v33 = vmul.f32 -1.442695, %v4370_v25 }
 0xa0d   :  { %v3360_v62 = vmul.f32 -1.442695, %v4371_v47  ;;  %v2558_v18 = vpop.f32.mrb[50].mxu0  ;;  %v2635_v38 = vpop.f32.mrb[40].mxu1  ;;  %v3362_v49 = vmul.f32 -1.442695, %v4403_v26 }
 0xa0e   :  { %4765 = vpow2.f32 %v3358_v33  ;;  %v4372_v39 = vadd.f32 %v2558_v18, %v5496_v16  ;;  %v2560_v41 = vpop.f32.mrb[51].mxu0  ;;  %v2637_v43 = vpop.f32.mrb[41].mxu1  ;;  %v2869_v26 = vld [vmem:[%s6230_s7 + $0x300] sm:$0xff] }
 0xa0f   :  { %4767 = vpow2.f32 %v3360_v62  ;;  %v4373_v42 = vadd.f32 %v2560_v41, %v5498_v20  ;;  %v4405_v4 = vadd.f32 %v2637_v43, %v5503_v40  ;;  %v4404_v20 = vadd.f32 %v2635_v38, %v5509_v61  ;;  %v2837_v41 = vld [vmem:[%s6230_s7 + $0x200] sm:$0xff]  ;;  %v2838_v43 = vld [vmem:[%s6230_s7 + $0x208] sm:$0xff] }
 0xa10   :  { %v3359_v37 = vmul.f32 -1.442695, %v4372_v39 }
 0xa11   :  { %v3361_v29 = vmul.f32 -1.442695, %v4373_v42  ;;  %v3363_v16 = vmul.f32 -1.442695, %v4405_v4  ;;  %v2856_v4 = vld [vmem:[%s6230_s7 + $0x298] sm:$0xff] }
 0xa12   :  { %4769 = vpow2.f32 %v3359_v37 }
 0xa13   :  { %4771 = vpow2.f32 %v3361_v29  ;;  %v2870_v29 = vld [vmem:[%s6230_s7 + $0x308] sm:$0xff] }
 0xa14   :  { %4773 = vpow2.f32 %v3362_v49  ;;  %v2855_v49 = vld [vmem:[%s6230_s7 + $0x290] sm:$0xff] }
 0xa15   :  { %4775 = vtanh.f32 %v4402_v6 }
 0xa18   :  { %v4766_v13 = vpop.eup %4765 }
 0xa19   :  { %v4768_v24 = vpop.eup %4767  ;;  %v2654_v28 = vadd.f32 1.0, %v4766_v13  ;;  %v4274_v13 = vpack.c.bf16 %v2838_v43, %v2837_v41  ;;  %v2850_v41 = vld [vmem:[%s6230_s7 + $0x268] sm:$0xff] }
 0xa1a   :  { %v2666_v30 = vadd.f32 1.0, %v4768_v24 }
 0xa1b   :  { %4777 = vrcp.f32 %v2654_v28 }
 0xa1c   :  { %v4770_v32 = vpop.eup %4769  ;;  %4779 = vrcp.f32 %v2666_v30  ;;  %v2839_v30 = vld [vmem:[%s6230_s7 + $0x210] sm:$0xff] }
 0xa1d   :  { %v4772_v46 = vpop.eup %4771  ;;  %v2655_v51 = vadd.f32 1.0, %v4770_v32  ;;  %4781 = vpow2.f32 %v3363_v16 }
 0xa1e   :  { %4783 = vtanh.f32 %v4404_v20  ;;  %v2667_v53 = vadd.f32 1.0, %v4772_v46  ;;  %v4774_v40 = vpop.eup %4773  ;;  %v2840_v20 = vld [vmem:[%s6230_s7 + $0x218] sm:$0xff]  ;;  %v4305_v46 = vpack.c.bf16 %v2870_v29, %v2869_v26  ;;  %v2881_v26 = vld [vmem:[%s6230_s7 + $0x360] sm:$0xff]  ;;  %v2882_v29 = vld [vmem:[%s6230_s7 + $0x368] sm:$0xff] }
 0xa1f   :  { %4785 = vrcp.f32 %v2655_v51  ;;  %v4776_v55 = vpop.eup %4775  ;;  %v2680_v7 = vadd.f32 1.0, %v4774_v40  ;;  %v4276_v51 = vpack.c.bf16 %v2856_v4, %v2855_v49  ;;  %v2858_v40 = vld [vmem:[%s6230_s7 + $0x2a8] sm:$0xff] }
 0xa20   :  { %4787 = vrcp.f32 %v2667_v53  ;;  %v2857_v53 = vld [vmem:[%s6230_s7 + $0x2a0] sm:$0xff] }
 0xa21   :  { %4789 = vrcp.f32 %v2680_v7  ;;  %v4280_v7 = vpack.c.bf16 %v2858_v40, %v2857_v53 }
 0xa25   :  { %v4778_v63 = vpop.eup %4777 }
 0xa26   :  { %v4780_v2 = vpop.eup %4779  ;;  %v2688_v5 = vmul.f32 %v4778_v63, %v4776_v55  ;;  %v2871_v63 = vld [vmem:[%s6230_s7 + $0x310] sm:$0xff] }
 0xa27   :  { %v4782_v23 = vpop.eup %4781  ;;  %v2686_v27 = vmul.f32 %v4780_v2, %v5823_v11  ;;  %v2872_v2 = vld [vmem:[%s6230_s7 + $0x318] sm:$0xff] }
 0xa28   :  { %v4784_v61 = vpop.eup %4783  ;;  %v2681_v50 = vadd.f32 1.0, %v4782_v23  ;;  %v2841_v23 = vld [vmem:[%s6230_s7 + $0x220] sm:$0xff] }
 0xa29   :  { %v4786_v31 = vpop.eup %4785  ;;  %v2690_v34 = vadd.f32 %v2688_v5, %v2686_v27  ;;  %v4278_v5 = vpack.c.bf16 %v2840_v20, %v2839_v30  ;;  %v2842_v27 = vld [vmem:[%s6230_s7 + $0x228] sm:$0xff]  ;;  %v2883_v30 = vld [vmem:[%s6230_s7 + $0x370] sm:$0xff]  ;;  %v2884_v20 = vld [vmem:[%s6230_s7 + $0x378] sm:$0xff] }
 0xa2a   :  { %v4788_v45 = vpop.eup %4787  ;;  %v2689_v52 = vmul.f32 %v4786_v31, %v4784_v61  ;;  %v4308_v61 = vpack.c.bf16 %v2872_v2, %v2871_v63  ;;  %v2859_v31 = vld [vmem:[%s6230_s7 + $0x2b0] sm:$0xff] }
 0xa2b   :  { %4791 = vtanh.f32 %v2690_v34  ;;  %v2687_v56 = vmul.f32 %v4788_v45, %v5827_v15  ;;  %v4790_v19 = vpop.eup %4789  ;;  %v2860_v34 = vld [vmem:[%s6230_s7 + $0x2b8] sm:$0xff]  ;;  %v2873_v45 = vld [vmem:[%s6230_s7 + $0x320] sm:$0xff] }
 0xa2c   :  { %4793 = vrcp.f32 %v2681_v50  ;;  %v4282_v50 = vpack.c.bf16 %v2842_v27, %v2841_v23 }
 0xa2d   :  { %v2691_v14 = vadd.f32 %v2689_v52, %v2687_v56  ;;  %v2874_v52 = vld [vmem:[%s6230_s7 + $0x328] sm:$0xff]  ;;  %v4284_v56 = vpack.c.bf16 %v2860_v34, %v2859_v31 }
 0xa2f   :  { %4795 = vtanh.f32 %v2691_v14  ;;  %v4311_v14 = vpack.c.bf16 %v2874_v52, %v2873_v45 }
 0xa35   :  { %v4792_v11 = vpop.eup %4791 }
 0xa36   :  { %v2694_v35 = vmul.f32 %v4792_v11, %v4790_v19  ;;  %v4794_v21 = vpop.eup %4793  ;;  %v2875_v19 = vld [vmem:[%s6230_s7 + $0x330] sm:$0xff]  ;;  %v2876_v11 = vld [vmem:[%s6230_s7 + $0x338] sm:$0xff] }
 0xa38   :  { %2696 = vst [vmem:[#allocation2] sm:$0x1] %v2694_v35  ;;  %v2704_v54 = vrot.slane %v2694_v35, %v6042_v48  ;;  %v2716_v0 = vcombine.high %v2694_v35, %v2694_v35  ;;  %v4286_v35 = vpack.c.bf16 %v2844_v9, %v2843_v8 }
 0xa39   :  { %v4796_v44 = vpop.eup %4795 }
 0xa3a   :  { %v3364_v59 = vrot.slane %v2704_v54, 9  ;;  %v2709_v15 = vcombine.high %v2704_v54, %v2704_v54  ;;  %v2723_v22 = vrot.slane %v2716_v0, %v6042_v48  ;;  %3366 = vst.sshfl [vmem:[#allocation2 + $0x8] sm:$0x1 pattern:$0x76325410] %v2716_v0  ;;  %v2695_v10 = vmul.f32 %v4796_v44, %v4794_v21  ;;  %v2845_v54 = vld [vmem:[%s6230_s7 + $0x240] sm:$0xff] }
 0xa3b   :  { %v2846_v0 = vld [vmem:[%s6230_s7 + $0x248] sm:$0xff]  ;;  %v4314_v44 = vpack.c.bf16 %v2876_v11, %v2875_v19 }
 0xa3c   :  { %2708 = vst [vmem:[#allocation2 + $0x2] sm:$0x1] %v3364_v59  ;;  %2711 = vst [vmem:[#allocation2 + $0x4] sm:$0x1] %v2709_v15  ;;  %v3365_v36 = vrot.slane %v2709_v15, 9  ;;  %v3367_v1 = vrot.slane %v2723_v22, 9  ;;  %v2730_v3 = vcombine.high %v2723_v22, %v2723_v22  ;;  %v2745_v25 = vrot.slane %v2695_v10, %v6042_v48 }
 0xa3d   :  { %2737 = vst [vmem:[#allocation2 + $0x3] sm:$0x1] %v2695_v10  ;;  %v2757_v58 = vcombine.high %v2695_v10, %v2695_v10  ;;  %v2863_v59 = vld [vmem:[%s6230_s7 + $0x2d0] sm:$0xff]  ;;  %v2864_v15 = vld [vmem:[%s6230_s7 + $0x2d8] sm:$0xff]  ;;  %v2877_v22 = vld [vmem:[%s6230_s7 + $0x340] sm:$0xff] }
 0xa3e   :  { %2715 = vst [vmem:[#allocation2 + $0x6] sm:$0x1] %v3365_v36  ;;  %2729 = vst [vmem:[#allocation2 + $0xa] sm:$0x1] %v3367_v1  ;;  %v3368_v57 = vrot.slane %v2730_v3, 9  ;;  %v3369_v47 = vrot.slane %v2745_v25, 9  ;;  %v2750_v33 = vcombine.high %v2745_v25, %v2745_v25  ;;  %v4290_v36 = vpack.c.bf16 %v2846_v0, %v2845_v54 }
 0xa3f   :  { %2732 = vst [vmem:[#allocation2 + $0xc] sm:$0x1] %v2730_v3  ;;  %v2764_v62 = vrot.slane %v2757_v58, %v6042_v48  ;;  %3371 = vst.sshfl [vmem:[#allocation2 + $0xb] sm:$0x1 pattern:$0x76325410] %v2757_v58  ;;  %v4292_v1 = vpack.c.bf16 %v2864_v15, %v2863_v59 }
 0xa40   :  { %2736 = vst [vmem:[#allocation2 + $0x1] sm:$0x1] %v3368_v57  ;;  %2749 = vst [vmem:[#allocation2 + $0x5] sm:$0x1] %v3369_v47  ;;  %v3370_v18 = vrot.slane %v2750_v33, 9  ;;  %v2878_v10 = vld [vmem:[%s6230_s7 + $0x348] sm:$0xff] }
 0xa41   :  { %2752 = vst [vmem:[#allocation2 + $0x7] sm:$0x1] %v2750_v33  ;;  %v3372_v38 = vrot.slane %v2764_v62, 9  ;;  %v2847_v3 = vld [vmem:[%s6230_s7 + $0x250] sm:$0xff]  ;;  %v2848_v25 = vld [vmem:[%s6230_s7 + $0x258] sm:$0xff]  ;;  %v4317_v58 = vpack.c.bf16 %v2878_v10, %v2877_v22  ;;  %v2865_v57 = vld [vmem:[%s6230_s7 + $0x2e0] sm:$0xff] }
 0xa42   :  { %2756 = vst [vmem:[#allocation2 + $0x9] sm:$0x1] %v3370_v18  ;;  %v2866_v47 = vld [vmem:[%s6230_s7 + $0x2e8] sm:$0xff]  ;;  %v2879_v33 = vld [vmem:[%s6230_s7 + $0x350] sm:$0xff]  ;;  %v2880_v62 = vld [vmem:[%s6230_s7 + $0x358] sm:$0xff]  ;;  %v4294_v18 = vpack.c.bf16 %v2848_v25, %v2847_v3 }
 0xa43   :  { %2770 = vst [vmem:[#allocation2 + $0xd] sm:$0x1] %v3372_v38  ;;  %v4296_v38 = vpack.c.bf16 %v2866_v47, %v2865_v57  ;;  %v4320_v43 = vpack.c.bf16 %v2880_v62, %v2879_v33 }
 0xa48   :  { %v2771_v39 = vld [vmem:[#allocation2] sm:$0xff] }
 0xa49   :  { %v2901_v42 = vrot.slane %v2771_v39, %v6042_v48  ;;  %v2894_v37 = vcombine.high %v2771_v39, %v2771_v39  ;;  %v2849_v39 = vld [vmem:[%s6230_s7 + $0x260] sm:$0xff] }
 0xa4a   :  { %v6068_v28 = vld [vmem:[#allocation2 + $0x8] sm:$0x3f]  ;;  %v4298_v49 = vpack.c.bf16 %v2850_v41, %v2849_v39 }
 0xa4b   :  { %v2909_v6 = vcombine.high %v2901_v42, %v2901_v42  ;;  %v2908_v24 = vrot.slane %v2894_v37, %v6042_v48  ;;  %v6072_v16 = vrot.slane %v6068_v28, %v6042_v48  ;;  %v2868_v37 = vld [vmem:[%s6230_s7 + $0x2f8] sm:$0xff] }
 0xa4d   :  { %2998 = vmatprep.mubr.f32.mxu0 %v2909_v6  ;;  %v2910_v32 = vcombine.high %v2908_v24, %v2908_v24  ;;  %v2926_v55 = vcombine.high %v6072_v16, %v6072_v16  ;;  %v2851_v6 = vld [vmem:[%s6230_s7 + $0x270] sm:$0xff] }
 0xa4e   :  { %2999 = vmatmul.mubr.f32.vlgmr.msra.gmra.mrb[52].mxu0 %v2901_v42  ;;  %v2867_v42 = vld [vmem:[%s6230_s7 + $0x2f0] sm:$0xff] }
 0xa4f   :  { %4275 = vmatpush3.bf16.msra.mxu0 %v4274_v13  ;;  %3068 = vmatprep.mubr.f32.mxu1 %v2910_v32  ;;  %v4300_v4 = vpack.c.bf16 %v2868_v37, %v2867_v42  ;;  %v2852_v13 = vld [vmem:[%s6230_s7 + $0x278] sm:$0xff] }
 0xa50   :  { %3138 = vmatprep.mubr.f32.mxu0 %v2926_v55  ;;  %3069 = vmatmul.mubr.f32.vlgmr.msra.gmra.mrb[42].mxu1 %v2908_v24  ;;  %v4323_v24 = vpack.c.bf16 %v2882_v29, %v2881_v26  ;;  %v4302_v32 = vpack.c.bf16 %v2852_v13, %v2851_v6  ;;  %v3373_v55 = vld [vmem:[%s6231_s8] ss:$0 sm:$0xff]  ;;  %s4829_s8 = smov [#allocation3]  }
 0xa51   :  { %4306 = vmatpush3.bf16.msra.mxu1 %v4305_v46  ;;  %4277 = vmatprep.subr.bf16.mxu0 %v4276_v51  ;;  %v4326_v46 = vpack.c.bf16 %v2884_v20, %v2883_v30  ;;  %v2911_v51 = vcombine.high %v6068_v28, %v6068_v28  ;;  %s3228_s11 = sshll.u32 %s4829_s8, 4  ;;  %s3229_s11 = int_to_ptr.vmem [resolvable:$true] %s3228_s11 }
 0xa52   :  { %4307 = vmatprep.subr.bf16.mxu1 %v4826_v60  ;;  %3649 = vmatprep.mubr.msk.f32.mxu1 %vm4828_vm4, %v4825_v12  ;;  %v2862_v12 = vld [vmem:[%s6230_s7 + $0x2c8] sm:$0xff]  ;;  %s4801_s12 = scalar_lea.vmem %s3229_s11, 32  ;;  %p4806_p1 = scmp.lt.s32.totalorder %s3229_s11, %s3229_s11 }
 0xa53   :  { %4279 = vmatpush3.bf16.msra.mxu0 %v4278_v5  ;;  %v4288_v21 = vpack.c.bf16 %v2862_v12, %v2861_v17  ;;  %v2925_v53 = vrot.slane %v2911_v51, %v6042_v48  ;;  %p4802_p0 = scmp.ne.s32.totalorder %s3229_s11, %s4801_s12  ;;  %p4807_p2 = scmp.lt.s32.totalorder %s4801_s12, %s4801_s12 }
 0xa54   :  { %4281 = vmatprep.subr.bf16.mxu0 %v4280_v7 }
 0xa55   :  { %4309 = vmatpush3.bf16.msra.mxu1 %v4308_v61  ;;  %p4808_p3 = por %p4807_p2, %p4806_p1 }
 0xa56   :  { %4310 = vmatprep.subr.bf16.mxu1 %v4826_v60 }
 0xa57   :  { %4283 = vmatpush3.bf16.msra.mxu0 %v4282_v50  ;;  %p4809_p4 = pnand %p4808_p3, %p4802_p0 }
 0xa58   :  { %4285 = vmatprep.subr.bf16.mxu0 %v4284_v56 }
 0xa59   :  { %4312 = vmatpush3.bf16.msra.mxu1 %v4311_v14 }
 0xa5a   :  { %4313 = vmatprep.subr.bf16.mxu1 %v4826_v60 }
 0xa5b   :  { %4287 = vmatpush3.bf16.msra.mxu0 %v4286_v35 }
 0xa5c   :  { %4289 = vmatprep.subr.bf16.mxu0 %v4288_v21 }
 0xa5d   :  { %4315 = vmatpush3.bf16.msra.mxu1 %v4314_v44 }
 0xa5e   :  { %4316 = vmatprep.subr.bf16.mxu1 %v4826_v60 }
 0xa5f   :  { %4291 = vmatpush3.bf16.msra.mxu0 %v4290_v36 }
 0xa60   :  { %4293 = vmatprep.subr.bf16.mxu0 %v4292_v1 }
 0xa61   :  { %4318 = vmatpush3.bf16.msra.mxu1 %v4317_v58 }
 0xa62   :  { %4319 = vmatprep.subr.bf16.mxu1 %v4826_v60 }
 0xa63   :  { %4295 = vmatpush3.bf16.msra.mxu0 %v4294_v18 }
 0xa64   :  { %4297 = vmatprep.subr.bf16.mxu0 %v4296_v38 }
 0xa65   :  { %4321 = vmatpush3.bf16.msra.mxu1 %v4320_v43 }
 0xa66   :  { %4322 = vmatprep.subr.bf16.mxu1 %v4826_v60 }
 0xa67   :  { %4299 = vmatpush3.bf16.msra.mxu0 %v4298_v49 }
 0xa68   :  { %4301 = vmatprep.subr.bf16.mxu0 %v4300_v4 }
 0xa69   :  { %4324 = vmatpush3.bf16.msra.mxu1 %v4323_v24 }
 0xa6a   :  { %4325 = vmatprep.subr.bf16.mxu1 %v4826_v60 }
 0xa6b   :  { %4303 = vmatpush3.bf16.msra.mxu0 %v4302_v32 }
 0xa6d   :  { %4327 = vmatpush3.bf16.msra.mxu1 %v4326_v46 }
 0xa6e   :  { %3139 = vmatmul.mubr.f32.vlgmr.msra.gmra.mrb[54].mxu0 %v6072_v16 }
 0xa70   :  { %3650 = vmatmul.mubr.f32.vlgmr.msra.gmra.mrb[44].mxu1 %v2925_v53 }
 0xb21   :  { %v3452_v40 = vpop.f32.mrb[52].mxu0 }
 0xb22   :  { %v3453_v63 = vpop.f32.mrb[53].mxu0 }
 0xb23   :  { %v3454_v2 = vadd.f32 %v3453_v63, %v3452_v40  ;;  %v3487_v5 = vpop.f32.mrb[42].mxu1 }
 0xb24   :  { %v3488_v7 = vpop.f32.mrb[43].mxu1 }
 0xb25   :  { %v3001_v23 = vadd.f32 %v3454_v2, %v3373_v55  ;;  %v3489_v28 = vadd.f32 %v3488_v7, %v3487_v5 }
 0xb27   :  { %v3071_v27 = vadd.f32 %v3489_v28, %v3001_v23 }
 0xb41   :  { %v3522_v60 = vpop.f32.mrb[54].mxu0 }
 0xb42   :  { %v3523_v61 = vpop.f32.mrb[55].mxu0 }
 0xb43   :  { %v3524_v31 = vadd.f32 %v3523_v61, %v3522_v60  ;;  %v3210_v34 = vpop.f32.mrb[44].mxu1 }
 0xb44   :  { %v3651_v16 = vpop.f32.mrb[45].mxu1 }
 0xb45   :  { %v3141_v45 = vadd.f32 %v3524_v31, %v3071_v27 }
 0xb47   :  { %v3211_v48 = vadd.f32 %v3210_v34, %v3141_v45 }
 0xb49   :  { %v3374_v52 = vmul.f32 -1.442695, %v3211_v48 }
 0xb4b   :  { %4797 = vpow2.f32 %v3374_v52 }
 0xb55   :  { %v4798_v50 = vpop.eup %4797 }
 0xb56   :  { %v3217_v56 = vadd.f32 1.0, %v4798_v50 }
 0xb58   :  { %4799 = vrcp.f32 %v3217_v56 }
 0xb62   :  { %v4800_v8 = vpop.eup %4799 }
 0xb63   :  { %3221 = vst.msk [vmem:[#allocation3] sm:$0x3] %vm3220_vm5, %v4800_v8 }
 0xb64   :  { %4812 = shalt.err (!%p4809_p4)
}
 0xb65   :  { %s4813_s14 = scalar_lea.hbm %s6232_s9, 32 }
 0xb66   :  { %p4814_p5 = scmp.ne.s32.totalorder %s6232_s9, %s4813_s14  ;;  %p4817_p6 = scmp.lt.u32.totalorder %s4813_s14, %s6232_s9 }
 0xb68   :  { %p4819_p7 = pnand %p4817_p6, %p4814_p5 }
 0xb6a   :  { %4822 = shalt.err (!%p4819_p7)
}
 0xb6b   :  { %3231 = dma.vmem_to_hbm [thread:$0]  %s3229_s11, 32, %s6232_s9, [#allocation4]  }
 0xb6c   :  { %4823 = dma.done.wait [#allocation4], 32  }
 0xb6d   :  { %4824 = vsyncadd [#allocation4], 4294967264 }
 0xb6e   :  { %3235 = vsyncpa [#allocation4], 1 }

</bundles_post_ra>
